<compile_context>
chip_gen: v7x
topology: tpu7x:2x2x1
jax: 0.10.0
libtpu: 0.0.40
codegen_flags: <defaults>
</compile_context>

<pallas_src>
import functools

import jax
import jax.numpy as jnp
from jax.experimental import pallas as pl
from jax.experimental.pallas import tpu as pltpu


# ----------------------------- fused Pallas kernel ------------------------------

def decoder_fused_kernel(tok_ref, hid_ref, cell_ref, emb_ref,
                         w0_ref, b0_ref, w1_ref, b1_ref, fcw_ref, fcb_ref,
                         pred_ref, hid_out_ref, cell_out_ref):
    """Embedding -> LSTM layer0 -> LSTM layer1 -> FC, all in VMEM.

    tok_ref:  (B, 1)     int32 token ids
    hid_ref:  (2, B, H)  previous hidden state
    cell_ref: (2, B, H)  previous cell state
    emb_ref:  (V, E)     embedding table
    w0_ref:   (E+H, 4H)  layer-0 stacked [W_ih^T; W_hh^T]
    b0_ref:   (1, 4H)    layer-0 b_ih + b_hh
    w1_ref:   (2H, 4H)   layer-1 stacked [W_ih^T; W_hh^T]
    b1_ref:   (1, 4H)    layer-1 b_ih + b_hh
    fcw_ref:  (H, O)     fc weight (transposed)
    fcb_ref:  (1, O)     fc bias
    """
    B = tok_ref.shape[0]
    V = emb_ref.shape[0]
    H = hid_ref.shape[-1]

    # ---- embedding: one-hot (B,V) @ (V,E) on the MXU (no separate XLA gather) ----
    # TODO(synk): for realistic vocab sizes keep the table in HBM (memory_space=pl.ANY)
    # and DMA-gather the B rows instead of a one-hot matmul over the full vocab.
    tok = tok_ref[...]                                                 # (B, 1) int32
    onehot = (tok == jax.lax.broadcasted_iota(jnp.int32, (B, V), 1)
              ).astype(jnp.float32)                                    # (B, V)
    x = jnp.dot(onehot, emb_ref[...], preferred_element_type=jnp.float32)  # (B, E)
    # TODO(synk): nn.Dropout(p) on the embedding (and between LSTM layers) is
    # identity in eval mode; train-mode dropout (mask + 1/(1-p) scaling) is not
    # implemented here.

    def lstm_cell(x_in, h_prev, c_prev, w_ref, b_ref):
        # Single fused gate matmul: [x, h] @ [[W_ih^T], [W_hh^T]] + (b_ih + b_hh).
        xh = jnp.concatenate([x_in, h_prev], axis=-1)                  # (B, D+H)
        gates = (jnp.dot(xh, w_ref[...], preferred_element_type=jnp.float32)
                 + b_ref[...])                                         # (B, 4H)
        # PyTorch gate order [i, f, g, o]; H is a multiple of 128 so each slice
        # is a full 128-lane aligned chunk (no lane shifts / relayouts).
        i = jax.nn.sigmoid(gates[:, 0 * H:1 * H])
        f = jax.nn.sigmoid(gates[:, 1 * H:2 * H])
        g = jnp.tanh(gates[:, 2 * H:3 * H])
        o = jax.nn.sigmoid(gates[:, 3 * H:4 * H])
        c_new = f * c_prev + i * g
        h_new = o * jnp.tanh(c_new)
        return h_new, c_new

    h0, c0 = lstm_cell(x, hid_ref[0], cell_ref[0], w0_ref, b0_ref)
    h1, c1 = lstm_cell(h0, hid_ref[1], cell_ref[1], w1_ref, b1_ref)

    # ---- fc on outputs (== h1 for seq_len == 1), then implicit squeeze(0) ----
    pred_ref[...] = (jnp.dot(h1, fcw_ref[...], preferred_element_type=jnp.float32)
                     + fcb_ref[...]).astype(pred_ref.dtype)

    # New state written directly as (2, B, H) slabs (no wrapper-side stack).
    hid_out_ref[0, :, :] = h0.astype(hid_out_ref.dtype)
    hid_out_ref[1, :, :] = h1.astype(hid_out_ref.dtype)
    cell_out_ref[0, :, :] = c0.astype(cell_out_ref.dtype)
    cell_out_ref[1, :, :] = c1.astype(cell_out_ref.dtype)


# ------------------------------ wrapper ------------------------------------

_VMEM = pl.BlockSpec(memory_space=pltpu.MemorySpace.VMEM)


@functools.partial(jax.jit, donate_argnums=(1, 2))
def decoder_forward(x_tokens, hidden, cell, params):
    """Mirrors Decoder.forward (eval mode).

    x_tokens: (B,) int32
    hidden:   (num_layers=2, B, H) float32
    cell:     (num_layers=2, B, H) float32
    returns (predictions (B, O), hidden (2, B, H), cell (2, B, H))
    """
    B = x_tokens.shape[0]
    O = params["fc_w_t"].shape[1]
    tok = x_tokens.reshape(B, 1).astype(jnp.int32)

    pred, hidden_new, cell_new = pl.pallas_call(
        decoder_fused_kernel,
        out_shape=(
            jax.ShapeDtypeStruct((B, O), jnp.float32),
            jax.ShapeDtypeStruct(hidden.shape, hidden.dtype),
            jax.ShapeDtypeStruct(cell.shape, cell.dtype),
        ),
        in_specs=[_VMEM] * 10,
        out_specs=(_VMEM, _VMEM, _VMEM),
        # P8: new hidden/cell reuse the old state's HBM buffers in place, so a
        # decode loop carries no extra state copies or reallocations.
        input_output_aliases={1: 1, 2: 2},
    )(tok, hidden, cell,
      params["embedding"], params["w0"], params["b0"],
      params["w1"], params["b1"], params["fc_w_t"], params["fc_b"])
    return pred, hidden_new, cell_new


# ------------------------- deterministic parameters --------------------------

def init_params(key, input_size, embedding_size, hidden_size, output_size):
    ks = jax.random.split(key, 11)
    E, H, O, V = embedding_size, hidden_size, output_size, input_size
    k = 1.0 / jnp.sqrt(hidden_size)

    def u(kk, shape):
        return jax.random.uniform(kk, shape, jnp.float32, -k, k)

    # Per-matrix LSTM weights (PyTorch layout, transposed for row-major x @ W^T),
    # then fused for the single-matmul cell:
    #   w_l = [[W_ih_l^T], [W_hh_l^T]]  (D+H, 4H),   b_l = b_ih_l + b_hh_l.
    wih0_t, whh0_t = u(ks[1], (E, 4 * H)), u(ks[2], (H, 4 * H))
    wih1_t, whh1_t = u(ks[5], (H, 4 * H)), u(ks[6], (H, 4 * H))
    # (On v5e one would additionally cast the weights to bf16 with f32 accumulation;
    #  kept in f32 here to match PyTorch numerics exactly.)
    params = {
        "embedding": jax.random.normal(ks[0], (V, E), jnp.float32),
        "w0": jnp.concatenate([wih0_t, whh0_t], axis=0),   # (E+H, 4H)
        "b0": u(ks[3], (1, 4 * H)) + u(ks[4], (1, 4 * H)),
        "w1": jnp.concatenate([wih1_t, whh1_t], axis=0),   # (2H, 4H)
        "b1": u(ks[7], (1, 4 * H)) + u(ks[8], (1, 4 * H)),
        "fc_w_t": u(ks[9], (H, O)),
        "fc_b": u(ks[10], (1, O)),
    }
    return params


# ---------------------------------- main -------------------------------------

if __name__ == "__main__":
    # Small, lane-dense, forward-consistent shapes.
    batch = 8
    input_size = 256       # decoder vocab (len(english.vocab)), scaled down
    embedding_size = 128
    hidden_size = 128      # lane-aligned stand-in for the reference 1024
    output_size = 256
    num_layers = 2

    key = jax.random.PRNGKey(0)
    kp, kx, kh, kc = jax.random.split(key, 4)

    params = init_params(kp, input_size, embedding_size, hidden_size, output_size)

    x_tokens = jax.random.randint(kx, (batch,), 0, input_size, dtype=jnp.int32)
    hidden = jax.random.normal(kh, (num_layers, batch, hidden_size), jnp.float32)
    cell = jax.random.normal(kc, (num_layers, batch, hidden_size), jnp.float32)

    preds, hidden_new, cell_new = decoder_forward(x_tokens, hidden, cell, params)
    jax.block_until_ready((preds, hidden_new, cell_new))

    assert preds.shape == (batch, output_size)
    assert hidden_new.shape == (num_layers, batch, hidden_size)
    assert cell_new.shape == (num_layers, batch, hidden_size)
    print("KERNEL_OK")
</pallas_src>

<mosaic_0001>
module attributes {stable_mosaic.version = 11 : i64} {
  func.func @decoder_fused_kernel(%arg0: memref<8x1xi32, #tpu.memory_space<vmem>>, %arg1: memref<2x8x128xf32, #tpu.memory_space<vmem>>, %arg2: memref<2x8x128xf32, #tpu.memory_space<vmem>>, %arg3: memref<256x128xf32, #tpu.memory_space<vmem>>, %arg4: memref<256x512xf32, #tpu.memory_space<vmem>>, %arg5: memref<1x512xf32, #tpu.memory_space<vmem>>, %arg6: memref<256x512xf32, #tpu.memory_space<vmem>>, %arg7: memref<1x512xf32, #tpu.memory_space<vmem>>, %arg8: memref<128x256xf32, #tpu.memory_space<vmem>>, %arg9: memref<1x256xf32, #tpu.memory_space<vmem>>, %arg10: memref<8x256xf32, #tpu.memory_space<vmem>>, %arg11: memref<2x8x128xf32, #tpu.memory_space<vmem>>, %arg12: memref<2x8x128xf32, #tpu.memory_space<vmem>>) attributes {dimension_semantics = [], scalar_prefetch = 0 : i64, scratch_operands = 0 : i64, tpu.core_type = #tpu.core_type<tc>} {
    %c0 = arith.constant 0 : index
    %c0_0 = arith.constant 0 : index
    %0 = vector.load %arg0[%c0, %c0_0] : memref<8x1xi32, #tpu.memory_space<vmem>>, vector<8x1xi32>
    %1 = tpu.iota {dimensions = array<i32: 1>} : vector<8x256xi32>
    %2 = vector.broadcast %0 : vector<8x1xi32> to vector<8x256xi32>
    %3 = arith.cmpi eq, %2, %1 : vector<8x256xi32>
    %4 = arith.extui %3 : vector<8x256xi1> to vector<8x256xi32>
    %5 = arith.sitofp %4 : vector<8x256xi32> to vector<8x256xf32>
    %c0_1 = arith.constant 0 : index
    %c0_2 = arith.constant 0 : index
    %6 = vector.load %arg3[%c0_1, %c0_2] : memref<256x128xf32, #tpu.memory_space<vmem>>, vector<256x128xf32>
    %cst = arith.constant dense<0.000000e+00> : vector<8x128xf32>
    %7 = tpu.matmul %5, %6, %cst {dimension_numbers = #tpu.dot_dimension_numbers<[1], [0], [0], [1], [0, 0, 1, 1], [], []>} : vector<8x256xf32>, vector<256x128xf32>, vector<8x128xf32> -> vector<8x128xf32>
    %c0_3 = arith.constant 0 : index
    %c0_4 = arith.constant 0 : index
    %c0_5 = arith.constant 0 : index
    %8 = vector.load %arg1[%c0_3, %c0_4, %c0_5] : memref<2x8x128xf32, #tpu.memory_space<vmem>>, vector<1x8x128xf32>
    %9 = vector.shape_cast %8 : vector<1x8x128xf32> to vector<8x128xf32>
    %c0_6 = arith.constant 0 : index
    %c0_7 = arith.constant 0 : index
    %c0_8 = arith.constant 0 : index
    %10 = vector.load %arg2[%c0_6, %c0_7, %c0_8] : memref<2x8x128xf32, #tpu.memory_space<vmem>>, vector<1x8x128xf32>
    %11 = vector.shape_cast %10 : vector<1x8x128xf32> to vector<8x128xf32>
    %12 = tpu.concatenate %7, %9 in 1 : vector<8x128xf32>, vector<8x128xf32> -> vector<8x256xf32>
    %c0_9 = arith.constant 0 : index
    %c0_10 = arith.constant 0 : index
    %13 = vector.load %arg4[%c0_9, %c0_10] : memref<256x512xf32, #tpu.memory_space<vmem>>, vector<256x512xf32>
    %cst_11 = arith.constant dense<0.000000e+00> : vector<8x512xf32>
    %14 = tpu.matmul %12, %13, %cst_11 {dimension_numbers = #tpu.dot_dimension_numbers<[1], [0], [0], [1], [0, 0, 1, 1], [], []>} : vector<8x256xf32>, vector<256x512xf32>, vector<8x512xf32> -> vector<8x512xf32>
    %c0_12 = arith.constant 0 : index
    %c0_13 = arith.constant 0 : index
    %15 = vector.load %arg5[%c0_12, %c0_13] : memref<1x512xf32, #tpu.memory_space<vmem>>, vector<1x512xf32>
    %16 = vector.broadcast %15 : vector<1x512xf32> to vector<8x512xf32>
    %17 = arith.addf %14, %16 : vector<8x512xf32>
    %18 = vector.extract_strided_slice %17 {offsets = [0, 0], sizes = [8, 128], strides = [1, 1]} : vector<8x512xf32> to vector<8x128xf32>
    %19 = arith.negf %18 : vector<8x128xf32>
    %20 = math.exp %19 : vector<8x128xf32>
    %cst_14 = arith.constant 1.000000e+00 : f32
    %21 = vector.broadcast %cst_14 : f32 to vector<8x128xf32>
    %22 = arith.addf %21, %20 : vector<8x128xf32>
    %23 = arith.divf %21, %22 : vector<8x128xf32>
    %24 = vector.extract_strided_slice %17 {offsets = [0, 128], sizes = [8, 128], strides = [1, 1]} : vector<8x512xf32> to vector<8x128xf32>
    %25 = arith.negf %24 : vector<8x128xf32>
    %26 = math.exp %25 : vector<8x128xf32>
    %cst_15 = arith.constant 1.000000e+00 : f32
    %27 = vector.broadcast %cst_15 : f32 to vector<8x128xf32>
    %28 = arith.addf %27, %26 : vector<8x128xf32>
    %29 = arith.divf %27, %28 : vector<8x128xf32>
    %30 = vector.extract_strided_slice %17 {offsets = [0, 256], sizes = [8, 128], strides = [1, 1]} : vector<8x512xf32> to vector<8x128xf32>
    %31 = math.tanh %30 : vector<8x128xf32>
    %32 = vector.extract_strided_slice %17 {offsets = [0, 384], sizes = [8, 128], strides = [1, 1]} : vector<8x512xf32> to vector<8x128xf32>
    %33 = arith.negf %32 : vector<8x128xf32>
    %34 = math.exp %33 : vector<8x128xf32>
    %cst_16 = arith.constant 1.000000e+00 : f32
    %35 = vector.broadcast %cst_16 : f32 to vector<8x128xf32>
    %36 = arith.addf %35, %34 : vector<8x128xf32>
    %37 = arith.divf %35, %36 : vector<8x128xf32>
    %38 = arith.mulf %29, %11 : vector<8x128xf32>
    %39 = arith.mulf %23, %31 : vector<8x128xf32>
    %40 = arith.addf %38, %39 : vector<8x128xf32>
    %41 = math.tanh %40 : vector<8x128xf32>
    %42 = arith.mulf %37, %41 : vector<8x128xf32>
    %c1 = arith.constant 1 : index
    %c0_17 = arith.constant 0 : index
    %c0_18 = arith.constant 0 : index
    %43 = vector.load %arg1[%c1, %c0_17, %c0_18] : memref<2x8x128xf32, #tpu.memory_space<vmem>>, vector<1x8x128xf32>
    %44 = vector.shape_cast %43 : vector<1x8x128xf32> to vector<8x128xf32>
    %c1_19 = arith.constant 1 : index
    %c0_20 = arith.constant 0 : index
    %c0_21 = arith.constant 0 : index
    %45 = vector.load %arg2[%c1_19, %c0_20, %c0_21] : memref<2x8x128xf32, #tpu.memory_space<vmem>>, vector<1x8x128xf32>
    %46 = vector.shape_cast %45 : vector<1x8x128xf32> to vector<8x128xf32>
    %47 = tpu.concatenate %42, %44 in 1 : vector<8x128xf32>, vector<8x128xf32> -> vector<8x256xf32>
    %c0_22 = arith.constant 0 : index
    %c0_23 = arith.constant 0 : index
    %48 = vector.load %arg6[%c0_22, %c0_23] : memref<256x512xf32, #tpu.memory_space<vmem>>, vector<256x512xf32>
    %cst_24 = arith.constant dense<0.000000e+00> : vector<8x512xf32>
    %49 = tpu.matmul %47, %48, %cst_24 {dimension_numbers = #tpu.dot_dimension_numbers<[1], [0], [0], [1], [0, 0, 1, 1], [], []>} : vector<8x256xf32>, vector<256x512xf32>, vector<8x512xf32> -> vector<8x512xf32>
    %c0_25 = arith.constant 0 : index
    %c0_26 = arith.constant 0 : index
    %50 = vector.load %arg7[%c0_25, %c0_26] : memref<1x512xf32, #tpu.memory_space<vmem>>, vector<1x512xf32>
    %51 = vector.broadcast %50 : vector<1x512xf32> to vector<8x512xf32>
    %52 = arith.addf %49, %51 : vector<8x512xf32>
    %53 = vector.extract_strided_slice %52 {offsets = [0, 0], sizes = [8, 128], strides = [1, 1]} : vector<8x512xf32> to vector<8x128xf32>
    %54 = arith.negf %53 : vector<8x128xf32>
    %55 = math.exp %54 : vector<8x128xf32>
    %cst_27 = arith.constant 1.000000e+00 : f32
    %56 = vector.broadcast %cst_27 : f32 to vector<8x128xf32>
    %57 = arith.addf %56, %55 : vector<8x128xf32>
    %58 = arith.divf %56, %57 : vector<8x128xf32>
    %59 = vector.extract_strided_slice %52 {offsets = [0, 128], sizes = [8, 128], strides = [1, 1]} : vector<8x512xf32> to vector<8x128xf32>
    %60 = arith.negf %59 : vector<8x128xf32>
    %61 = math.exp %60 : vector<8x128xf32>
    %cst_28 = arith.constant 1.000000e+00 : f32
    %62 = vector.broadcast %cst_28 : f32 to vector<8x128xf32>
    %63 = arith.addf %62, %61 : vector<8x128xf32>
    %64 = arith.divf %62, %63 : vector<8x128xf32>
    %65 = vector.extract_strided_slice %52 {offsets = [0, 256], sizes = [8, 128], strides = [1, 1]} : vector<8x512xf32> to vector<8x128xf32>
    %66 = math.tanh %65 : vector<8x128xf32>
    %67 = vector.extract_strided_slice %52 {offsets = [0, 384], sizes = [8, 128], strides = [1, 1]} : vector<8x512xf32> to vector<8x128xf32>
    %68 = arith.negf %67 : vector<8x128xf32>
    %69 = math.exp %68 : vector<8x128xf32>
    %cst_29 = arith.constant 1.000000e+00 : f32
    %70 = vector.broadcast %cst_29 : f32 to vector<8x128xf32>
    %71 = arith.addf %70, %69 : vector<8x128xf32>
    %72 = arith.divf %70, %71 : vector<8x128xf32>
    %73 = arith.mulf %64, %46 : vector<8x128xf32>
    %74 = arith.mulf %58, %66 : vector<8x128xf32>
    %75 = arith.addf %73, %74 : vector<8x128xf32>
    %76 = math.tanh %75 : vector<8x128xf32>
    %77 = arith.mulf %72, %76 : vector<8x128xf32>
    %c0_30 = arith.constant 0 : index
    %c0_31 = arith.constant 0 : index
    %78 = vector.load %arg8[%c0_30, %c0_31] : memref<128x256xf32, #tpu.memory_space<vmem>>, vector<128x256xf32>
    %cst_32 = arith.constant dense<0.000000e+00> : vector<8x256xf32>
    %79 = tpu.matmul %77, %78, %cst_32 {dimension_numbers = #tpu.dot_dimension_numbers<[1], [0], [0], [1], [0, 0, 1, 1], [], []>} : vector<8x128xf32>, vector<128x256xf32>, vector<8x256xf32> -> vector<8x256xf32>
    %c0_33 = arith.constant 0 : index
    %c0_34 = arith.constant 0 : index
    %80 = vector.load %arg9[%c0_33, %c0_34] : memref<1x256xf32, #tpu.memory_space<vmem>>, vector<1x256xf32>
    %81 = vector.broadcast %80 : vector<1x256xf32> to vector<8x256xf32>
    %82 = arith.addf %79, %81 : vector<8x256xf32>
    %c0_35 = arith.constant 0 : index
    %c0_36 = arith.constant 0 : index
    %83 = vector.load %arg10[%c0_35, %c0_36] : memref<8x256xf32, #tpu.memory_space<vmem>>, vector<8x256xf32>
    tpu.vector_store %arg10[%c0_35, %c0_36], %82 {strides = array<i32>} : memref<8x256xf32, #tpu.memory_space<vmem>>, vector<8x256xf32>,
    %c0_37 = arith.constant 0 : index
    %c0_38 = arith.constant 0 : index
    %c0_39 = arith.constant 0 : index
    %84 = vector.load %arg11[%c0_37, %c0_38, %c0_39] : memref<2x8x128xf32, #tpu.memory_space<vmem>>, vector<1x8x128xf32>
    %85 = vector.shape_cast %84 : vector<1x8x128xf32> to vector<8x128xf32>
    %86 = vector.shape_cast %42 : vector<8x128xf32> to vector<1x8x128xf32>
    tpu.vector_store %arg11[%c0_37, %c0_38, %c0_39], %86 {strides = array<i32>} : memref<2x8x128xf32, #tpu.memory_space<vmem>>, vector<1x8x128xf32>,
    %c1_40 = arith.constant 1 : index
    %c0_41 = arith.constant 0 : index
    %c0_42 = arith.constant 0 : index
    %87 = vector.load %arg11[%c1_40, %c0_41, %c0_42] : memref<2x8x128xf32, #tpu.memory_space<vmem>>, vector<1x8x128xf32>
    %88 = vector.shape_cast %87 : vector<1x8x128xf32> to vector<8x128xf32>
    %89 = vector.shape_cast %77 : vector<8x128xf32> to vector<1x8x128xf32>
    tpu.vector_store %arg11[%c1_40, %c0_41, %c0_42], %89 {strides = array<i32>} : memref<2x8x128xf32, #tpu.memory_space<vmem>>, vector<1x8x128xf32>,
    %c0_43 = arith.constant 0 : index
    %c0_44 = arith.constant 0 : index
    %c0_45 = arith.constant 0 : index
    %90 = vector.load %arg12[%c0_43, %c0_44, %c0_45] : memref<2x8x128xf32, #tpu.memory_space<vmem>>, vector<1x8x128xf32>
    %91 = vector.shape_cast %90 : vector<1x8x128xf32> to vector<8x128xf32>
    %92 = vector.shape_cast %40 : vector<8x128xf32> to vector<1x8x128xf32>
    tpu.vector_store %arg12[%c0_43, %c0_44, %c0_45], %92 {strides = array<i32>} : memref<2x8x128xf32, #tpu.memory_space<vmem>>, vector<1x8x128xf32>,
    %c1_46 = arith.constant 1 : index
    %c0_47 = arith.constant 0 : index
    %c0_48 = arith.constant 0 : index
    %93 = vector.load %arg12[%c1_46, %c0_47, %c0_48] : memref<2x8x128xf32, #tpu.memory_space<vmem>>, vector<1x8x128xf32>
    %94 = vector.shape_cast %93 : vector<1x8x128xf32> to vector<8x128xf32>
    %95 = vector.shape_cast %75 : vector<8x128xf32> to vector<1x8x128xf32>
    tpu.vector_store %arg12[%c1_46, %c0_47, %c0_48], %95 {strides = array<i32>} : memref<2x8x128xf32, #tpu.memory_space<vmem>>, vector<1x8x128xf32>,
    return
  }
}

</mosaic_0001>

<bundles_post_ra>
// kernel: decoder_forward.1
= control target key start
LH: loop header
LB: loop body
LE: loop exit
PB: predicated region body
PF: predicated region fallthrough
CT: control target
= control target key end

     0   :  { %18 = vsyncpa [#allocation3], 0  ;;  %s1944_s0 = inlined_call_operand.vmem [shape: s32[8,1], index: 0, kind: input, shape index: {}]   ;;  %s1945_s1 = inlined_call_operand.hbm [shape: f32[2,8,128], index: 1, kind: input, shape index: {}, may-alias: {1,11}]   ;;  %s1946_s2 = inlined_call_operand.hbm [shape: f32[2,8,128], index: 2, kind: input, shape index: {}, may-alias: {2,12}]   ;;  %s1947_s3 = inlined_call_operand.hbm [shape: f32[256,128], index: 3, kind: input, shape index: {}]   ;;  %s1948_s4 = inlined_call_operand.hbm [shape: f32[256,512], index: 4, kind: input, shape index: {}]   ;;  %s1949_s5 = inlined_call_operand.vmem [shape: f32[1,512], index: 5, kind: input, shape index: {}]   ;;  %s1950_s6 = inlined_call_operand.hbm [shape: f32[256,512], index: 6, kind: input, shape index: {}]   ;;  %s1951_s7 = inlined_call_operand.vmem [shape: f32[1,512], index: 7, kind: input, shape index: {}]   ;;  %s1952_s8 = inlined_call_operand.hbm [shape: f32[128,256], index: 8, kind: input, shape index: {}]   ;;  %s1953_s9 = inlined_call_operand.vmem [shape: f32[1,256], index: 9, kind: input, shape index: {}]   ;;  %s1954_s10 = inlined_call_operand.hbm [shape: f32[8,256], index: 10, kind: output, shape index: {0}]   ;;  %s1955_s11 = inlined_call_operand.hbm [shape: f32[2,8,128], index: 11, kind: output, shape index: {1}, may-alias: {1,11}]   ;;  %s1956_s12 = inlined_call_operand.hbm [shape: f32[2,8,128], index: 12, kind: output, shape index: {2}, may-alias: {2,12}]  }
   0x1   :  { %19 = vsyncpa [#allocation6], 0 }
   0x2   :  { %20 = vsyncpa [#allocation9], 0 }
   0x3   :  { %21 = vsyncpa [#allocation12], 0 }
   0x4   :  { %22 = vsyncpa [#allocation4], 0 }
   0x5   :  { %23 = vsyncpa [#allocation15], 0  ;;  %s1673_s21 = smov [#allocation5]   ;;  %s1674_s23 = smov [#allocation8]  }
   0x6   :  { %s43_s22 = sshll.u32 %s1673_s21, 4  ;;  %s67_s24 = sshll.u32 %s1674_s23, 4  ;;  %s44_s22 = int_to_ptr.vmem [resolvable:$true] %s43_s22  ;;  %s1756_s24 = int_to_ptr.vmem [resolvable:$true] %s67_s24 }
   0x7   :  { %s1463_s27 = scalar_lea.hbm %s1946_s2, 256 }
   0x8   :  { %p1464_p0 = scmp.ne.s32.totalorder %s1946_s2, %s1463_s27  ;;  %p1467_p1 = scmp.lt.u32.totalorder %s1463_s27, %s1946_s2 }
   0xa   :  { %p1469_p2 = pnand %p1467_p1, %p1464_p0 }
   0xc   :  { %1472 = shalt.err (!%p1469_p2)
}
   0xd   :  { %s1473_s14 = scalar_lea.vmem %s44_s22, 256  ;;  %p1478_p4 = scmp.lt.s32.totalorder %s44_s22, %s44_s22 }
   0xe   :  { %p1474_p3 = scmp.ne.s32.totalorder %s44_s22, %s1473_s14  ;;  %p1479_p5 = scmp.lt.s32.totalorder %s1473_s14, %s1473_s14 }
  0x10   :  { %p1480_p6 = por %p1479_p5, %p1478_p4 }
  0x12   :  { %p1481_p7 = pnand %p1480_p6, %p1474_p3 }
  0x14   :  { %1484 = shalt.err (!%p1481_p7)
}
  0x15   :  { %s1675_s15 = smov 128   ;;  %s1676_s16 = smov 8  }
  0x16   :  { %49 = dma.hbm_to_vmem [thread:$0]  %s1946_s2, 256, %s44_s22, [#allocation6], %s1675_s15, %s1675_s15, %s1676_s16  }
  0x17   :  { %s1485_s21 = scalar_lea.hbm %s1948_s4, 16384 }
  0x18   :  { %p1486_p8 = scmp.ne.s32.totalorder %s1948_s4, %s1485_s21  ;;  %p1489_p9 = scmp.lt.u32.totalorder %s1485_s21, %s1948_s4 }
  0x1a   :  { %p1491_p10 = pnand %p1489_p9, %p1486_p8 }
  0x1c   :  { %1494 = shalt.err (!%p1491_p10)
}
  0x1d   :  { %s1495_s28 = scalar_lea.vmem %s1756_s24, 16384  ;;  %p1500_p12 = scmp.lt.s32.totalorder %s1756_s24, %s1756_s24 }
  0x1e   :  { %p1496_p11 = scmp.ne.s32.totalorder %s1756_s24, %s1495_s28  ;;  %p1501_p13 = scmp.lt.s32.totalorder %s1495_s28, %s1495_s28 }
  0x20   :  { %p1502_p0 = por %p1501_p13, %p1500_p12 }
  0x22   :  { %p1503_p1 = pnand %p1502_p0, %p1496_p11 }
  0x24   :  { %1506 = shalt.err (!%p1503_p1)
}
  0x25   :  { %s1677_s2 = smov 512   ;;  %s1678_s22 = smov 32  }
  0x26   :  { %73 = dma.hbm_to_vmem [thread:$0]  %s1948_s4, 16384, %s1756_s24, [#allocation9], %s1677_s2, %s1677_s2, %s1678_s22  }
  0x27   :  { %s1679_s13 = smov [#allocation2]   ;;  %s1680_s17 = smov [#allocation7]  }
  0x28   :  { %s31_s14 = sshll.u32 %s1679_s13, 4  ;;  %s55_s18 = sshll.u32 %s1680_s17, 4  ;;  %s32_s14 = int_to_ptr.vmem [resolvable:$true] %s31_s14  ;;  %s1793_s18 = int_to_ptr.vmem [resolvable:$true] %s55_s18 }
  0x29   :  { %s1507_s21 = scalar_lea.hbm %s1945_s1, 256 }
  0x2a   :  { %p1508_p2 = scmp.ne.s32.totalorder %s1945_s1, %s1507_s21  ;;  %p1511_p3 = scmp.lt.u32.totalorder %s1507_s21, %s1945_s1 }
  0x2c   :  { %p1513_p4 = pnand %p1511_p3, %p1508_p2 }
  0x2e   :  { %1516 = shalt.err (!%p1513_p4)
}
  0x2f   :  { %s1517_s4 = scalar_lea.vmem %s32_s14, 256  ;;  %p1522_p6 = scmp.lt.s32.totalorder %s32_s14, %s32_s14 }
  0x30   :  { %p1518_p5 = scmp.ne.s32.totalorder %s32_s14, %s1517_s4  ;;  %p1523_p7 = scmp.lt.s32.totalorder %s1517_s4, %s1517_s4 }
  0x32   :  { %p1524_p8 = por %p1523_p7, %p1522_p6 }
  0x34   :  { %p1525_p9 = pnand %p1524_p8, %p1518_p5 }
  0x36   :  { %1528 = shalt.err (!%p1525_p9)
}
  0x37   :  { %37 = dma.hbm_to_vmem [thread:$0]  %s1945_s1, 256, %s32_s14, [#allocation3], %s1675_s15, %s1675_s15, %s1676_s16  }
  0x38   :  { %s1529_s13 = scalar_lea.hbm %s1947_s3, 4096 }
  0x39   :  { %p1530_p10 = scmp.ne.s32.totalorder %s1947_s3, %s1529_s13  ;;  %p1533_p11 = scmp.lt.u32.totalorder %s1529_s13, %s1947_s3 }
  0x3b   :  { %p1535_p12 = pnand %p1533_p11, %p1530_p10 }
  0x3d   :  { %1538 = shalt.err (!%p1535_p12)
}
  0x3e   :  { %s1539_s23 = scalar_lea.vmem %s1793_s18, 4096  ;;  %p1544_p0 = scmp.lt.s32.totalorder %s1793_s18, %s1793_s18 }
  0x3f   :  { %p1540_p13 = scmp.ne.s32.totalorder %s1793_s18, %s1539_s23  ;;  %p1545_p1 = scmp.lt.s32.totalorder %s1539_s23, %s1539_s23 }
  0x41   :  { %p1546_p2 = por %p1545_p1, %p1544_p0 }
  0x43   :  { %p1547_p3 = pnand %p1546_p2, %p1540_p13 }
  0x45   :  { %1550 = shalt.err (!%p1547_p3)
}
  0x46   :  { %61 = dma.hbm_to_vmem [thread:$0]  %s1947_s3, 4096, %s1793_s18, [#allocation6], %s1675_s15, %s1675_s15, %s1676_s16  }
  0x47   :  { %s1681_s25 = smov [#allocation10]   ;;  %s1682_s27 = smov [#allocation11]  }
  0x48   :  { %s81_s26 = sshll.u32 %s1681_s25, 4  ;;  %s95_s4 = sshll.u32 %s1682_s27, 4  ;;  %s82_s26 = int_to_ptr.vmem [resolvable:$true] %s81_s26  ;;  %s1830_s4 = int_to_ptr.vmem [resolvable:$true] %s95_s4 }
  0x49   :  { %s1551_s29 = scalar_lea.hbm %s1950_s6, 16384 }
  0x4a   :  { %p1552_p4 = scmp.ne.s32.totalorder %s1950_s6, %s1551_s29  ;;  %p1555_p5 = scmp.lt.u32.totalorder %s1551_s29, %s1950_s6 }
  0x4c   :  { %p1557_p6 = pnand %p1555_p5, %p1552_p4 }
  0x4e   :  { %1560 = shalt.err (!%p1557_p6)
}
  0x4f   :  { %s1561_s3 = scalar_lea.vmem %s82_s26, 16384  ;;  %p1566_p8 = scmp.lt.s32.totalorder %s82_s26, %s82_s26 }
  0x50   :  { %p1562_p7 = scmp.ne.s32.totalorder %s82_s26, %s1561_s3  ;;  %p1567_p9 = scmp.lt.s32.totalorder %s1561_s3, %s1561_s3 }
  0x52   :  { %p1568_p10 = por %p1567_p9, %p1566_p8 }
  0x54   :  { %p1569_p11 = pnand %p1568_p10, %p1562_p7 }
  0x56   :  { %1572 = shalt.err (!%p1569_p11)
}
  0x57   :  { %87 = dma.hbm_to_vmem [thread:$0]  %s1950_s6, 16384, %s82_s26, [#allocation9], %s1677_s2, %s1677_s2, %s1678_s22  }
  0x58   :  { %s1573_s1 = scalar_lea.hbm %s1952_s8, 4096 }
  0x59   :  { %p1574_p12 = scmp.ne.s32.totalorder %s1952_s8, %s1573_s1  ;;  %p1577_p13 = scmp.lt.u32.totalorder %s1573_s1, %s1952_s8 }
  0x5b   :  { %p1579_p0 = pnand %p1577_p13, %p1574_p12 }
  0x5d   :  { %1582 = shalt.err (!%p1579_p0)
}
  0x5e   :  { %s1583_s28 = scalar_lea.vmem %s1830_s4, 4096  ;;  %p1588_p2 = scmp.lt.s32.totalorder %s1830_s4, %s1830_s4 }
  0x5f   :  { %p1584_p1 = scmp.ne.s32.totalorder %s1830_s4, %s1583_s28  ;;  %p1589_p3 = scmp.lt.s32.totalorder %s1583_s28, %s1583_s28 }
  0x61   :  { %p1590_p4 = por %p1589_p3, %p1588_p2 }
  0x63   :  { %p1591_p5 = pnand %p1590_p4, %p1584_p1 }
  0x65   :  { %1594 = shalt.err (!%p1591_p5)
}
  0x66   :  { %s1683_s6 = smov 256   ;;  %s1684_s2 = smov 16  }
  0x67   :  { %101 = dma.hbm_to_vmem [thread:$0]  %s1952_s8, 4096, %s1830_s4, [#allocation12], %s1683_s6, %s1683_s6, %s1684_s2  }
  0x68   :  { %1661 = dma.done.wait [#allocation3], 256  }
  0x69   :  { %1662 = vsyncadd [#allocation3], 4294967040 }
  0x6a   :  { %1663 = dma.done.wait [#allocation6], 4352  }
  0x6b   :  { %1664 = vsyncadd [#allocation6], 4294962944 }
  0x6c   :  { %1665 = dma.done.wait [#allocation9], 32768  }
  0x6d   :  { %1666 = vsyncadd [#allocation9], 4294934528 }
  0x6e   :  { %1667 = dma.done.wait [#allocation12], 4096  }
  0x6f   :  { %1668 = vsyncadd [#allocation12], 4294963200  ;;  %v1685_v0 = vmov 0   ;;  %v122_v1 = vld [vmem:[%s1944_s0] sm:$0xff]  ;;  %v152_v3 = vld [vmem:[#allocation7 + $0x88] sm:$0xff] }
  0x70   :  { %1430 = vset.pattern.permute.xlu0 %v1685_v0  ;;  %v151_v2 = vld [vmem:[#allocation7 + $0x80] sm:$0xff]  ;;  %v136_v6 = vld [vmem:[#allocation7 + $0x8] sm:$0xff]  ;;  %v153_v7 = vld [vmem:[#allocation7 + $0x90] sm:$0xff] }
  0x71   :  { %127 = vperm.xlu0 %1430, %v122_v1   ;;  %v1092_v4 = vpack.c.bf16 %v152_v3, %v151_v2  ;;  %v135_v5 = vld [vmem:[#allocation7] sm:$0xff]  ;;  %v154_v9 = vld [vmem:[#allocation7 + $0x98] sm:$0xff]  ;;  %v137_v10 = vld [vmem:[#allocation7 + $0x10] sm:$0xff] }
  0x72   :  { %v1094_v8 = vpack.c.bf16 %v136_v6, %v135_v5  ;;  %v138_v11 = vld [vmem:[#allocation7 + $0x18] sm:$0xff]  ;;  %v1096_v12 = vpack.c.bf16 %v154_v9, %v153_v7  ;;  %v155_v13 = vld [vmem:[#allocation7 + $0xa0] sm:$0xff]  ;;  %v156_v14 = vld [vmem:[#allocation7 + $0xa8] sm:$0xff] }
  0x73   :  { %1093 = vmatprep.subr.bf16.mxu0 %v1092_v4  ;;  %v1098_v15 = vpack.c.bf16 %v138_v11, %v137_v10  ;;  %v1100_v16 = vpack.c.bf16 %v156_v14, %v155_v13  ;;  %v139_v17 = vld [vmem:[#allocation7 + $0x20] sm:$0xff]  ;;  %v140_v18 = vld [vmem:[#allocation7 + $0x28] sm:$0xff]  ;;  %v157_v19 = vld [vmem:[#allocation7 + $0xb0] sm:$0xff] }
  0x74   :  { %1095 = vmatpush3.bf16.msra.mxu0 %v1094_v8  ;;  %v158_v20 = vld [vmem:[#allocation7 + $0xb8] sm:$0xff]  ;;  %v1102_v21 = vpack.c.bf16 %v140_v18, %v139_v17  ;;  %v141_v23 = vld [vmem:[#allocation7 + $0x30] sm:$0xff]  ;;  %v159_v25 = vld [vmem:[#allocation7 + $0xc0] sm:$0xff] }
  0x75   :  { %1097 = vmatprep.subr.bf16.mxu0 %v1096_v12  ;;  %v1104_v22 = vpack.c.bf16 %v158_v20, %v157_v19  ;;  %v142_v24 = vld [vmem:[#allocation7 + $0x38] sm:$0xff]  ;;  %v160_v26 = vld [vmem:[#allocation7 + $0xc8] sm:$0xff]  ;;  %v239_v31 = vld [vmem:[#allocation8] sm:$0xff] }
  0x76   :  { %v240_v27 = vld [vmem:[#allocation8 + $0x8] sm:$0xff]  ;;  %v1106_v29 = vpack.c.bf16 %v142_v24, %v141_v23  ;;  %v243_v32 = vld [vmem:[#allocation8 + $0x20] sm:$0xff]  ;;  %v1108_v33 = vpack.c.bf16 %v160_v26, %v159_v25  ;;  %v161_v38 = vld [vmem:[#allocation7 + $0xd0] sm:$0xff] }
  0x77   :  { %v244_v28 = vld [vmem:[#allocation8 + $0x28] sm:$0xff]  ;;  %v143_v34 = vld [vmem:[#allocation7 + $0x40] sm:$0xff]  ;;  %v1126_v36 = vpack.c.bf16 %v243_v32, %v239_v31  ;;  %v162_v39 = vld [vmem:[#allocation7 + $0xd8] sm:$0xff] }
  0x78   :  { %1099 = vmatpush3.bf16.msra.mxu0 %v1098_v15  ;;  %v1124_v30 = vpack.c.bf16 %v244_v28, %v240_v27  ;;  %v144_v35 = vld [vmem:[#allocation7 + $0x48] sm:$0xff]  ;;  %v247_v42 = vld [vmem:[#allocation8 + $0x40] sm:$0xff]  ;;  %v1112_v48 = vpack.c.bf16 %v162_v39, %v161_v38  ;;  %v145_v49 = vld [vmem:[#allocation7 + $0x50] sm:$0xff] }
  0x79   :  { %1101 = vmatprep.subr.bf16.mxu0 %v1100_v16  ;;  %v248_v37 = vld [vmem:[#allocation8 + $0x48] sm:$0xff]  ;;  %v251_v43 = vld [vmem:[#allocation8 + $0x60] sm:$0xff]  ;;  %v1110_v44 = vpack.c.bf16 %v144_v35, %v143_v34  ;;  %v146_v50 = vld [vmem:[#allocation7 + $0x58] sm:$0xff] }
  0x7a   :  { %1125 = vmatprep.subr.bf16.mxu1 %v1124_v30  ;;  %v252_v40 = vld [vmem:[#allocation8 + $0x68] sm:$0xff]  ;;  %v1130_v45 = vpack.c.bf16 %v251_v43, %v247_v42  ;;  %v255_v52 = vld [vmem:[#allocation8 + $0x80] sm:$0xff]  ;;  %v1114_v59 = vpack.c.bf16 %v146_v50, %v145_v49  ;;  %v165_v3 = vld [vmem:[#allocation7 + $0xf0] sm:$0xff] }
  0x7b   :  { %1127 = vmatpush1.bf16.msra.mxu1 %v1126_v36  ;;  %v1128_v41 = vpack.c.bf16 %v252_v40, %v248_v37  ;;  %v256_v46 = vld [vmem:[#allocation8 + $0x88] sm:$0xff]  ;;  %v163_v53 = vld [vmem:[#allocation7 + $0xe0] sm:$0xff]  ;;  %v166_v4 = vld [vmem:[#allocation7 + $0xf8] sm:$0xff] }
  0x7c   :  { %1103 = vmatpush3.bf16.msra.mxu0 %v1102_v21  ;;  %v260_v47 = vld [vmem:[#allocation8 + $0xa8] sm:$0xff]  ;;  %v259_v55 = vld [vmem:[#allocation8 + $0xa0] sm:$0xff]  ;;  %v149_v8 = vld [vmem:[#allocation7 + $0x70] sm:$0xff]  ;;  %v1120_v12 = vpack.c.bf16 %v166_v4, %v165_v3 }
  0x7d   :  { %1105 = vmatprep.subr.bf16.mxu0 %v1104_v22  ;;  %1129 = vmatprep.subr.bf16.mxu1 %v1128_v41  ;;  %v1132_v51 = vpack.c.bf16 %v260_v47, %v256_v46  ;;  %v164_v54 = vld [vmem:[#allocation7 + $0xe8] sm:$0xff]  ;;  %v1134_v56 = vpack.c.bf16 %v259_v55, %v255_v52  ;;  %v263_v61 = vld [vmem:[#allocation8 + $0xc0] sm:$0xff]  ;;  %v150_v13 = vld [vmem:[#allocation7 + $0x78] sm:$0xff] }
  0x7e   :  { %v264_v57 = vld [vmem:[#allocation8 + $0xc8] sm:$0xff]  ;;  %v267_v62 = vld [vmem:[#allocation8 + $0xe0] sm:$0xff]  ;;  %v1116_v63 = vpack.c.bf16 %v164_v54, %v163_v53  ;;  %v242_v16 = vld [vmem:[#allocation8 + $0x18] sm:$0xff]  ;;  %v1122_v19 = vpack.c.bf16 %v150_v13, %v149_v8 }
  0x7f   :  { %1131 = vmatpush1.bf16.msra.mxu1 %v1130_v45  ;;  %v268_v58 = vld [vmem:[#allocation8 + $0xe8] sm:$0xff]  ;;  %v147_v0 = vld [vmem:[#allocation7 + $0x60] sm:$0xff]  ;;  %v1138_v6 = vpack.c.bf16 %v267_v62, %v263_v61  ;;  %v246_v17 = vld [vmem:[#allocation8 + $0x38] sm:$0xff] }
  0x80   :  { %1107 = vmatpush3.bf16.msra.mxu0 %v1106_v29  ;;  %1133 = vmatprep.subr.bf16.mxu1 %v1132_v51  ;;  %v1136_v60 = vpack.c.bf16 %v268_v58, %v264_v57  ;;  %v148_v1 = vld [vmem:[#allocation7 + $0x68] sm:$0xff]  ;;  %v271_v10 = vld [vmem:[#allocation8 + $0x100] sm:$0xff]  ;;  %v1188_v23 = vpack.c.bf16 %v246_v17, %v242_v16 }
  0x81   :  { %1109 = vmatprep.subr.bf16.mxu0 %v1108_v33  ;;  %v272_v2 = vld [vmem:[#allocation8 + $0x108] sm:$0xff]  ;;  %v1118_v7 = vpack.c.bf16 %v148_v1, %v147_v0  ;;  %v275_v11 = vld [vmem:[#allocation8 + $0x120] sm:$0xff] }
  0x82   :  { %v276_v5 = vld [vmem:[#allocation8 + $0x128] sm:$0xff]  ;;  %v1142_v18 = vpack.c.bf16 %v275_v11, %v271_v10  ;;  %v279_v21 = vld [vmem:[#allocation8 + $0x140] sm:$0xff] }
  0x83   :  { %1135 = vmatpush1.bf16.msra.mxu1 %v1134_v56  ;;  %v1140_v9 = vpack.c.bf16 %v276_v5, %v272_v2  ;;  %v280_v14 = vld [vmem:[#allocation8 + $0x148] sm:$0xff]  ;;  %v283_v22 = vld [vmem:[#allocation8 + $0x160] sm:$0xff] }
  0x84   :  { %1111 = vmatpush3.bf16.msra.mxu0 %v1110_v44  ;;  %1137 = vmatprep.subr.bf16.mxu1 %v1136_v60  ;;  %v284_v15 = vld [vmem:[#allocation8 + $0x168] sm:$0xff]  ;;  %v1146_v26 = vpack.c.bf16 %v283_v22, %v279_v21  ;;  %v287_v28 = vld [vmem:[#allocation8 + $0x180] sm:$0xff]  ;;  %v254_v21 = vld [vmem:[#allocation8 + $0x78] sm:$0xff] }
  0x85   :  { %1113 = vmatprep.subr.bf16.mxu0 %v1112_v48  ;;  %v1144_v20 = vpack.c.bf16 %v284_v15, %v280_v14  ;;  %v288_v24 = vld [vmem:[#allocation8 + $0x188] sm:$0xff]  ;;  %v291_v29 = vld [vmem:[#allocation8 + $0x1a0] sm:$0xff]  ;;  %v123_v15 = vlaneseq }
  0x86   :  { %v292_v25 = vld [vmem:[#allocation8 + $0x1a8] sm:$0xff]  ;;  %v1150_v32 = vpack.c.bf16 %v291_v29, %v287_v28  ;;  %v295_v34 = vld [vmem:[#allocation8 + $0x1c0] sm:$0xff]  ;;  %v258_v28 = vld [vmem:[#allocation8 + $0x98] sm:$0xff] }
  0x87   :  { %1139 = vmatpush1.bf16.msra.mxu1 %v1138_v6  ;;  %v1148_v27 = vpack.c.bf16 %v292_v25, %v288_v24  ;;  %v296_v30 = vld [vmem:[#allocation8 + $0x1c8] sm:$0xff]  ;;  %v299_v35 = vld [vmem:[#allocation8 + $0x1e0] sm:$0xff]  ;;  %v124_v16 = vand.u32 127, %v123_v15  ;;  %v249_v25 = vld [vmem:[#allocation8 + $0x50] sm:$0xff] }
  0x88   :  { %1115 = vmatpush3.bf16.msra.mxu0 %v1114_v59  ;;  %1141 = vmatprep.subr.bf16.mxu1 %v1140_v9  ;;  %v300_v31 = vld [vmem:[#allocation8 + $0x1e8] sm:$0xff]  ;;  %v1154_v38 = vpack.c.bf16 %v299_v35, %v295_v34  ;;  %v303_v40 = vld [vmem:[#allocation8 + $0x200] sm:$0xff]  ;;  %v262_v29 = vld [vmem:[#allocation8 + $0xb8] sm:$0xff] }
  0x89   :  { %1117 = vmatprep.subr.bf16.mxu0 %v1116_v63  ;;  %v1152_v33 = vpack.c.bf16 %v300_v31, %v296_v30  ;;  %v304_v36 = vld [vmem:[#allocation8 + $0x208] sm:$0xff]  ;;  %v307_v41 = vld [vmem:[#allocation8 + $0x220] sm:$0xff]  ;;  %v125_v17 = vadd.s32 128, %v124_v16  ;;  %v1196_v31 = vpack.c.bf16 %v262_v29, %v258_v28  ;;  %v266_v34 = vld [vmem:[#allocation8 + $0xd8] sm:$0xff] }
  0x8a   :  { %v308_v37 = vld [vmem:[#allocation8 + $0x228] sm:$0xff]  ;;  %v1158_v44 = vpack.c.bf16 %v307_v41, %v303_v40  ;;  %v311_v46 = vld [vmem:[#allocation8 + $0x240] sm:$0xff]  ;;  %v270_v35 = vld [vmem:[#allocation8 + $0xf8] sm:$0xff] }
  0x8b   :  { %1143 = vmatpush1.bf16.msra.mxu1 %v1142_v18  ;;  %v1156_v39 = vpack.c.bf16 %v308_v37, %v304_v36  ;;  %v312_v42 = vld [vmem:[#allocation8 + $0x248] sm:$0xff]  ;;  %v315_v47 = vld [vmem:[#allocation8 + $0x260] sm:$0xff]  ;;  %v241_v18 = vld [vmem:[#allocation8 + $0x10] sm:$0xff]  ;;  %v1200_v37 = vpack.c.bf16 %v270_v35, %v266_v34 }
  0x8c   :  { %1119 = vmatpush3.bf16.msra.mxu0 %v1118_v7  ;;  %1145 = vmatprep.subr.bf16.mxu1 %v1144_v20  ;;  %v316_v43 = vld [vmem:[#allocation8 + $0x268] sm:$0xff]  ;;  %v1162_v50 = vpack.c.bf16 %v315_v47, %v311_v46  ;;  %v319_v52 = vld [vmem:[#allocation8 + $0x280] sm:$0xff]  ;;  %v250_v20 = vld [vmem:[#allocation8 + $0x58] sm:$0xff] }
  0x8d   :  { %1121 = vmatprep.subr.bf16.mxu0 %v1120_v12  ;;  %v1160_v45 = vpack.c.bf16 %v316_v43, %v312_v42  ;;  %v320_v48 = vld [vmem:[#allocation8 + $0x288] sm:$0xff]  ;;  %v323_v53 = vld [vmem:[#allocation8 + $0x2a0] sm:$0xff]  ;;  %v1192_v24 = vpack.c.bf16 %v254_v21, %v250_v20  ;;  %v274_v40 = vld [vmem:[#allocation8 + $0x118] sm:$0xff] }
  0x8e   :  { %v324_v49 = vld [vmem:[#allocation8 + $0x2a8] sm:$0xff]  ;;  %v1166_v56 = vpack.c.bf16 %v323_v53, %v319_v52  ;;  %v327_v58 = vld [vmem:[#allocation8 + $0x2c0] sm:$0xff]  ;;  %v278_v41 = vld [vmem:[#allocation8 + $0x138] sm:$0xff] }
  0x8f   :  { %1147 = vmatpush1.bf16.msra.mxu1 %v1146_v26  ;;  %v1164_v51 = vpack.c.bf16 %v324_v49, %v320_v48  ;;  %v328_v54 = vld [vmem:[#allocation8 + $0x2c8] sm:$0xff]  ;;  %v331_v59 = vld [vmem:[#allocation8 + $0x2e0] sm:$0xff]  ;;  %v253_v26 = vld [vmem:[#allocation8 + $0x70] sm:$0xff]  ;;  %v1204_v43 = vpack.c.bf16 %v278_v41, %v274_v40 }
  0x90   :  { %1123 = vmatpush3.bf16.msra.mxu0 %v1122_v19  ;;  %1149 = vmatprep.subr.bf16.mxu1 %v1148_v27  ;;  %v332_v55 = vld [vmem:[#allocation8 + $0x2e8] sm:$0xff]  ;;  %v1170_v62 = vpack.c.bf16 %v331_v59, %v327_v58  ;;  %v335_v0 = vld [vmem:[#allocation8 + $0x300] sm:$0xff]  ;;  %v245_v19 = vld [vmem:[#allocation8 + $0x30] sm:$0xff]  ;;  %v1686_v27 = vmov 1.0   ;;  %v1194_v30 = vpack.c.bf16 %v253_v26, %v249_v25 }
  0x91   :  { %1189 = vmatprep.subr.bf16.mxu0 %v1188_v23  ;;  %v1168_v57 = vpack.c.bf16 %v332_v55, %v328_v54  ;;  %v336_v60 = vld [vmem:[#allocation8 + $0x308] sm:$0xff]  ;;  %v339_v1 = vld [vmem:[#allocation8 + $0x320] sm:$0xff]  ;;  %v1190_v23 = vpack.c.bf16 %v245_v19, %v241_v18  ;;  %v282_v46 = vld [vmem:[#allocation8 + $0x158] sm:$0xff] }
  0x92   :  { %v340_v61 = vld [vmem:[#allocation8 + $0x328] sm:$0xff]  ;;  %v1174_v4 = vpack.c.bf16 %v339_v1, %v335_v0  ;;  %v343_v6 = vld [vmem:[#allocation8 + $0x340] sm:$0xff]  ;;  %v286_v47 = vld [vmem:[#allocation8 + $0x178] sm:$0xff] }
  0x93   :  { %1151 = vmatpush1.bf16.msra.mxu1 %v1150_v32  ;;  %v1172_v63 = vpack.c.bf16 %v340_v61, %v336_v60  ;;  %v344_v2 = vld [vmem:[#allocation8 + $0x348] sm:$0xff]  ;;  %v347_v7 = vld [vmem:[#allocation8 + $0x360] sm:$0xff]  ;;  %v257_v32 = vld [vmem:[#allocation8 + $0x90] sm:$0xff]  ;;  %v1208_v49 = vpack.c.bf16 %v286_v47, %v282_v46 }
  0x94   :  { %1153 = vmatprep.subr.bf16.mxu1 %v1152_v33  ;;  %v348_v3 = vld [vmem:[#allocation8 + $0x368] sm:$0xff]  ;;  %v1178_v10 = vpack.c.bf16 %v347_v7, %v343_v6  ;;  %v351_v12 = vld [vmem:[#allocation8 + $0x380] sm:$0xff]  ;;  %v261_v33 = vld [vmem:[#allocation8 + $0xb0] sm:$0xff] }
  0x95   :  { %v1176_v5 = vpack.c.bf16 %v348_v3, %v344_v2  ;;  %v352_v8 = vld [vmem:[#allocation8 + $0x388] sm:$0xff]  ;;  %v355_v13 = vld [vmem:[#allocation8 + $0x3a0] sm:$0xff]  ;;  %v1198_v36 = vpack.c.bf16 %v261_v33, %v257_v32  ;;  %v290_v52 = vld [vmem:[#allocation8 + $0x198] sm:$0xff] }
  0x96   :  { %v356_v9 = vld [vmem:[#allocation8 + $0x3a8] sm:$0xff]  ;;  %v1182_v14 = vpack.c.bf16 %v355_v13, %v351_v12  ;;  %v294_v53 = vld [vmem:[#allocation8 + $0x1b8] sm:$0xff]  ;;  %v325_v18 = vld [vmem:[#allocation8 + $0x2b0] sm:$0xff] }
  0x97   :  { %1155 = vmatpush1.bf16.msra.mxu1 %v1154_v38  ;;  %v1180_v11 = vpack.c.bf16 %v356_v9, %v352_v8  ;;  %v265_v38 = vld [vmem:[#allocation8 + $0xd0] sm:$0xff]  ;;  %v1212_v55 = vpack.c.bf16 %v294_v53, %v290_v52  ;;  %v298_v58 = vld [vmem:[#allocation8 + $0x1d8] sm:$0xff] }
  0x98   :  { %1157 = vmatprep.subr.bf16.mxu1 %v1156_v39  ;;  %v269_v39 = vld [vmem:[#allocation8 + $0xf0] sm:$0xff]  ;;  %v302_v59 = vld [vmem:[#allocation8 + $0x1f8] sm:$0xff] }
  0x99   :  { %v1202_v42 = vpack.c.bf16 %v269_v39, %v265_v38  ;;  %v1216_v61 = vpack.c.bf16 %v302_v59, %v298_v58  ;;  %v306_v0 = vld [vmem:[#allocation8 + $0x218] sm:$0xff]  ;;  %v337_v29 = vld [vmem:[#allocation8 + $0x310] sm:$0xff]  ;;  %v564_v58 = vld [vmem:[#allocation10 + $0x28] sm:$0xff] }
  0x9a   :  { %v310_v1 = vld [vmem:[#allocation8 + $0x238] sm:$0xff]  ;;  %v345_v35 = vld [vmem:[#allocation8 + $0x350] sm:$0xff] }
  0x9b   :  { %1159 = vmatpush1.bf16.msra.mxu1 %v1158_v44  ;;  %v273_v44 = vld [vmem:[#allocation8 + $0x110] sm:$0xff]  ;;  %v1220_v3 = vpack.c.bf16 %v310_v1, %v306_v0  ;;  %v314_v6 = vld [vmem:[#allocation8 + $0x258] sm:$0xff]  ;;  %v563_v0 = vld [vmem:[#allocation10 + $0x20] sm:$0xff] }
  0x9c   :  { %1161 = vmatprep.subr.bf16.mxu1 %v1160_v45  ;;  %v277_v45 = vld [vmem:[#allocation8 + $0x130] sm:$0xff]  ;;  %v318_v7 = vld [vmem:[#allocation8 + $0x278] sm:$0xff] }
  0x9d   :  { %v1206_v48 = vpack.c.bf16 %v277_v45, %v273_v44  ;;  %v1224_v9 = vpack.c.bf16 %v318_v7, %v314_v6  ;;  %v322_v12 = vld [vmem:[#allocation8 + $0x298] sm:$0xff]  ;;  %v353_v41 = vld [vmem:[#allocation8 + $0x390] sm:$0xff]  ;;  %v360_v44 = vld [vmem:[#allocation8 + $0x3c8] sm:$0xff] }
  0x9e   :  { %v326_v13 = vld [vmem:[#allocation8 + $0x2b8] sm:$0xff]  ;;  %v364_v45 = vld [vmem:[#allocation8 + $0x3e8] sm:$0xff]  ;;  %v361_v53 = vld [vmem:[#allocation8 + $0x3d0] sm:$0xff] }
  0x9f   :  { %1163 = vmatpush1.bf16.msra.mxu1 %v1162_v50  ;;  %v281_v50 = vld [vmem:[#allocation8 + $0x150] sm:$0xff]  ;;  %v330_v19 = vld [vmem:[#allocation8 + $0x2d8] sm:$0xff]  ;;  %v1184_v47 = vpack.c.bf16 %v364_v45, %v360_v44  ;;  %v596_v44 = vld [vmem:[#allocation10 + $0x128] sm:$0xff] }
  0xa0   :  { %1165 = vmatprep.subr.bf16.mxu1 %v1164_v51  ;;  %v285_v51 = vld [vmem:[#allocation8 + $0x170] sm:$0xff]  ;;  %v334_v20 = vld [vmem:[#allocation8 + $0x2f8] sm:$0xff] }
  0xa1   :  { %v1210_v54 = vpack.c.bf16 %v285_v51, %v281_v50  ;;  %v338_v25 = vld [vmem:[#allocation8 + $0x318] sm:$0xff]  ;;  %v363_v50 = vld [vmem:[#allocation8 + $0x3e0] sm:$0xff]  ;;  %v561_v1 = vld [vmem:[#allocation10 + $0x10] sm:$0xff] }
  0xa2   :  { %v342_v26 = vld [vmem:[#allocation8 + $0x338] sm:$0xff] }
  0xa3   :  { %1167 = vmatpush1.bf16.msra.mxu1 %v1166_v56  ;;  %v289_v56 = vld [vmem:[#allocation8 + $0x190] sm:$0xff]  ;;  %v1236_v28 = vpack.c.bf16 %v342_v26, %v338_v25  ;;  %v350_v32 = vld [vmem:[#allocation8 + $0x378] sm:$0xff]  ;;  %v575_v25 = vld [vmem:[#allocation10 + $0x80] sm:$0xff] }
  0xa4   :  { %1169 = vmatprep.subr.bf16.mxu1 %v1168_v57  ;;  %v293_v57 = vld [vmem:[#allocation8 + $0x1b0] sm:$0xff]  ;;  %v358_v38 = vld [vmem:[#allocation8 + $0x3b8] sm:$0xff]  ;;  %v579_v26 = vld [vmem:[#allocation10 + $0xa0] sm:$0xff] }
  0xa5   :  { %v1214_v60 = vpack.c.bf16 %v293_v57, %v289_v56  ;;  %v362_v46 = vld [vmem:[#allocation8 + $0x3d8] sm:$0xff]  ;;  %v237_v56 = vld [vmem:[#allocation2] sm:$0xff]  ;;  %v560_v57 = vld [vmem:[#allocation10 + $0x8] sm:$0xff] }
  0xa6   :  { %453 = vmatprep.mubr.f32.mxu1 %v237_v56  ;;  %v562_v59 = vld [vmem:[#allocation10 + $0x18] sm:$0xff] }
  0xa7   :  { %1171 = vmatpush1.bf16.msra.mxu1 %v1170_v62  ;;  %v297_v62 = vld [vmem:[#allocation8 + $0x1d0] sm:$0xff]  ;;  %v574_v6 = vld [vmem:[#allocation10 + $0x78] sm:$0xff] }
  0xa8   :  { %1173 = vmatprep.subr.bf16.mxu1 %v1172_v63  ;;  %v301_v63 = vld [vmem:[#allocation8 + $0x1f0] sm:$0xff]  ;;  %v594_v45 = vld [vmem:[#allocation10 + $0x118] sm:$0xff] }
  0xa9   :  { %v1218_v2 = vpack.c.bf16 %v301_v63, %v297_v62  ;;  %v559_v63 = vld [vmem:[#allocation10] sm:$0xff] }
  0xab   :  { %1175 = vmatpush1.bf16.msra.mxu1 %v1174_v4  ;;  %v305_v4 = vld [vmem:[#allocation8 + $0x210] sm:$0xff] }
  0xac   :  { %1177 = vmatprep.subr.bf16.mxu1 %v1176_v5  ;;  %v309_v5 = vld [vmem:[#allocation8 + $0x230] sm:$0xff] }
  0xad   :  { %v1222_v8 = vpack.c.bf16 %v309_v5, %v305_v4  ;;  %v572_v4 = vld [vmem:[#allocation10 + $0x68] sm:$0xff]  ;;  %v570_v5 = vld [vmem:[#allocation10 + $0x58] sm:$0xff] }
  0xaf   :  { %1179 = vmatpush1.bf16.msra.mxu1 %v1178_v10  ;;  %v313_v10 = vld [vmem:[#allocation8 + $0x250] sm:$0xff] }
  0xb0   :  { %1181 = vmatprep.subr.bf16.mxu1 %v1180_v11  ;;  %v317_v11 = vld [vmem:[#allocation8 + $0x270] sm:$0xff] }
  0xb3   :  { %1183 = vmatpush1.bf16.msra.mxu1 %v1182_v14  ;;  %v1226_v14 = vpack.c.bf16 %v317_v11, %v313_v10  ;;  %v567_v11 = vld [vmem:[#allocation10 + $0x40] sm:$0xff] }
  0xb4   :  { %1185 = vmatprep.subr.bf16.mxu1 %v1184_v47 }
  0xf0   :  { %v128_v22 = vpop.permute.xlu0 %127 }
  0xf1   :  { %vm129_vm0 = vcmp.eq.s32.totalorder %v128_v22, %v124_v16  ;;  %vm130_vm1 = vcmp.eq.s32.totalorder %v128_v22, %v125_v17  ;;  %v1228_v16 = vpack.c.bf16 %v326_v13, %v322_v12  ;;  %v321_v17 = vld [vmem:[#allocation8 + $0x290] sm:$0xff]  ;;  %v1232_v22 = vpack.c.bf16 %v334_v20, %v330_v19  ;;  %v571_v12 = vld [vmem:[#allocation10 + $0x60] sm:$0xff]  ;;  %v576_v19 = vld [vmem:[#allocation10 + $0x88] sm:$0xff] }
  0xf2   :  { %1049 = vmatprep.mubr.msk.f32.mxu0 %vm130_vm1, %v1686_v27  ;;  %v1230_v21 = vpack.c.bf16 %v325_v18, %v321_v17  ;;  %v569_v17 = vld [vmem:[#allocation10 + $0x50] sm:$0xff]  ;;  %v580_v20 = vld [vmem:[#allocation10 + $0xa8] sm:$0xff] }
  0xf3   :  { %1050 = vmatmul.mubr.msk.f32.vlgmr.msra.gmra.mrb[0].mxu0 %vm129_vm0, %v1686_v27  ;;  %v573_v18 = vld [vmem:[#allocation10 + $0x70] sm:$0xff] }
  0xf4   :  { %1191 = vmatpush1.bf16.msra.mxu0 %v1190_v23  ;;  %v329_v23 = vld [vmem:[#allocation8 + $0x2d0] sm:$0xff]  ;;  %524 = vmatprep.mubr.f32.mxu0 %v237_v56 }
  0xf5   :  { %1193 = vmatprep.subr.bf16.mxu0 %v1192_v24  ;;  %v333_v24 = vld [vmem:[#allocation8 + $0x2f0] sm:$0xff] }
  0xf6   :  { %v1234_v27 = vpack.c.bf16 %v333_v24, %v329_v23  ;;  %v1258_v23 = vpack.c.bf16 %v571_v12, %v567_v11  ;;  %v1322_v24 = vpack.c.bf16 %v573_v18, %v569_v17  ;;  %v611_v11 = vld [vmem:[#allocation10 + $0x1a0] sm:$0xff]  ;;  %v616_v18 = vld [vmem:[#allocation10 + $0x1c8] sm:$0xff] }
  0xf8   :  { %1195 = vmatpush1.bf16.msra.mxu0 %v1194_v30  ;;  %v341_v30 = vld [vmem:[#allocation8 + $0x330] sm:$0xff] }
  0xf9   :  { %1197 = vmatprep.subr.bf16.mxu0 %v1196_v31  ;;  %v346_v31 = vld [vmem:[#allocation8 + $0x358] sm:$0xff]  ;;  %v1238_v33 = vpack.c.bf16 %v341_v30, %v337_v29  ;;  %v577_v29 = vld [vmem:[#allocation10 + $0x90] sm:$0xff] }
  0xfa   :  { %v1240_v34 = vpack.c.bf16 %v350_v32, %v346_v31  ;;  %v581_v30 = vld [vmem:[#allocation10 + $0xb0] sm:$0xff]  ;;  %v584_v31 = vld [vmem:[#allocation10 + $0xc8] sm:$0xff] }
  0xfb   :  { %v588_v32 = vld [vmem:[#allocation10 + $0xe8] sm:$0xff] }
  0xfc   :  { %1199 = vmatpush1.bf16.msra.mxu0 %v1198_v36  ;;  %v349_v36 = vld [vmem:[#allocation8 + $0x370] sm:$0xff] }
  0xfd   :  { %1201 = vmatprep.subr.bf16.mxu0 %v1200_v37  ;;  %v354_v37 = vld [vmem:[#allocation8 + $0x398] sm:$0xff]  ;;  %v1242_v39 = vpack.c.bf16 %v349_v36, %v345_v35  ;;  %v1262_v35 = vpack.c.bf16 %v579_v26, %v575_v25  ;;  %v1326_v36 = vpack.c.bf16 %v581_v30, %v577_v29  ;;  %v624_v30 = vld [vmem:[#allocation10 + $0x208] sm:$0xff] }
  0xfe   :  { %v1244_v40 = vpack.c.bf16 %v358_v38, %v354_v37  ;;  %v583_v37 = vld [vmem:[#allocation10 + $0xc0] sm:$0xff] }
  0xff   :  { %v587_v38 = vld [vmem:[#allocation10 + $0xe0] sm:$0xff] }
 0x100   :  { %1203 = vmatpush1.bf16.msra.mxu0 %v1202_v42  ;;  %v357_v42 = vld [vmem:[#allocation8 + $0x3b0] sm:$0xff]  ;;  %v1266_v47 = vpack.c.bf16 %v587_v38, %v583_v37 }
 0x101   :  { %1205 = vmatprep.subr.bf16.mxu0 %v1204_v43  ;;  %v1246_v43 = vpack.c.bf16 %v357_v42, %v353_v41  ;;  %v585_v41 = vld [vmem:[#allocation10 + $0xd0] sm:$0xff] }
 0x102   :  { %v589_v42 = vld [vmem:[#allocation10 + $0xf0] sm:$0xff] }
 0x104   :  { %1207 = vmatpush1.bf16.msra.mxu0 %v1206_v48  ;;  %v366_v48 = vld [vmem:[#allocation8 + $0x3f8] sm:$0xff] }
 0x105   :  { %1209 = vmatprep.subr.bf16.mxu0 %v1208_v49  ;;  %v359_v49 = vld [vmem:[#allocation8 + $0x3c0] sm:$0xff]  ;;  %v1248_v51 = vpack.c.bf16 %v366_v48, %v362_v46  ;;  %v598_v46 = vld [vmem:[#allocation10 + $0x138] sm:$0xff]  ;;  %v1330_v48 = vpack.c.bf16 %v589_v42, %v585_v41  ;;  %v632_v42 = vld [vmem:[#allocation10 + $0x248] sm:$0xff] }
 0x106   :  { %v1186_v52 = vpack.c.bf16 %v363_v50, %v359_v49  ;;  %v1332_v50 = vpack.c.bf16 %v598_v46, %v594_v45  ;;  %v638_v46 = vld [vmem:[#allocation10 + $0x278] sm:$0xff] }
 0x108   :  { %1211 = vmatpush1.bf16.msra.mxu0 %v1210_v54  ;;  %v365_v54 = vld [vmem:[#allocation8 + $0x3f0] sm:$0xff]  ;;  %1187 = vmatpush1.bf16.msra.mxu1 %v1186_v52  ;;  %v595_v52 = vld [vmem:[#allocation10 + $0x120] sm:$0xff] }
 0x109   :  { %1213 = vmatprep.subr.bf16.mxu0 %v1212_v55  ;;  %v1250_v55 = vpack.c.bf16 %v365_v54, %v361_v53  ;;  %v593_v53 = vld [vmem:[#allocation10 + $0x110] sm:$0xff] }
 0x10c   :  { %1215 = vmatpush1.bf16.msra.mxu0 %v1214_v60  ;;  %v1252_v60 = vpack.c.bf16 %v564_v58, %v560_v57  ;;  %v600_v57 = vld [vmem:[#allocation10 + $0x148] sm:$0xff] }
 0x10d   :  { %1217 = vmatprep.subr.bf16.mxu0 %v1216_v61  ;;  %v566_v61 = vld [vmem:[#allocation10 + $0x38] sm:$0xff]  ;;  %v604_v58 = vld [vmem:[#allocation10 + $0x168] sm:$0xff] }
 0x10e   :  { %v1316_v62 = vpack.c.bf16 %v566_v61, %v562_v59  ;;  %1253 = vmatprep.subr.bf16.mxu1 %v1252_v60  ;;  %v602_v59 = vld [vmem:[#allocation10 + $0x158] sm:$0xff]  ;;  %v1272_v60 = vpack.c.bf16 %v604_v58, %v600_v57 }
 0x10f   :  { %v606_v61 = vld [vmem:[#allocation10 + $0x178] sm:$0xff] }
 0x110   :  { %1219 = vmatpush1.bf16.msra.mxu0 %v1218_v2  ;;  %v565_v2 = vld [vmem:[#allocation10 + $0x30] sm:$0xff]  ;;  %v646_v58 = vld [vmem:[#allocation10 + $0x2b8] sm:$0xff] }
 0x111   :  { %1221 = vmatprep.subr.bf16.mxu0 %v1220_v3  ;;  %v568_v3 = vld [vmem:[#allocation10 + $0x48] sm:$0xff]  ;;  %v1318_v10 = vpack.c.bf16 %v565_v2, %v561_v1  ;;  %v601_v2 = vld [vmem:[#allocation10 + $0x150] sm:$0xff] }
 0x114   :  { %1223 = vmatpush1.bf16.msra.mxu0 %v1222_v8 }
 0x115   :  { %1225 = vmatprep.subr.bf16.mxu0 %v1224_v9  ;;  %v1254_v9 = vpack.c.bf16 %v563_v0, %v559_v63  ;;  %v603_v63 = vld [vmem:[#allocation10 + $0x160] sm:$0xff]  ;;  %v1336_v0 = vpack.c.bf16 %v606_v61, %v602_v59 }
 0x116   :  { %v639_v59 = vld [vmem:[#allocation10 + $0x280] sm:$0xff] }
 0x118   :  { %1227 = vmatpush1.bf16.msra.mxu0 %v1226_v14  ;;  %v1256_v14 = vpack.c.bf16 %v572_v4, %v568_v3  ;;  %v605_v3 = vld [vmem:[#allocation10 + $0x170] sm:$0xff] }
 0x119   :  { %1229 = vmatprep.subr.bf16.mxu0 %v1228_v16  ;;  %v1320_v16 = vpack.c.bf16 %v574_v6, %v570_v5  ;;  %v1338_v4 = vpack.c.bf16 %v605_v3, %v601_v2  ;;  %v608_v5 = vld [vmem:[#allocation10 + $0x188] sm:$0xff] }
 0x11a   :  { %v612_v6 = vld [vmem:[#allocation10 + $0x1a8] sm:$0xff] }
 0x11b   :  { %v648_v2 = vld [vmem:[#allocation10 + $0x2c8] sm:$0xff] }
 0x11c   :  { %1231 = vmatpush1.bf16.msra.mxu0 %v1230_v21  ;;  %v578_v21 = vld [vmem:[#allocation10 + $0x98] sm:$0xff]  ;;  %v652_v3 = vld [vmem:[#allocation10 + $0x2e8] sm:$0xff] }
 0x11d   :  { %1233 = vmatprep.subr.bf16.mxu0 %v1232_v22  ;;  %v582_v22 = vld [vmem:[#allocation10 + $0xb8] sm:$0xff] }
 0x120   :  { %1235 = vmatpush1.bf16.msra.mxu0 %v1234_v27  ;;  %v1260_v27 = vpack.c.bf16 %v580_v20, %v576_v19  ;;  %v620_v19 = vld [vmem:[#allocation10 + $0x1e8] sm:$0xff]  ;;  %v618_v20 = vld [vmem:[#allocation10 + $0x1d8] sm:$0xff] }
 0x121   :  { %1237 = vmatprep.subr.bf16.mxu0 %v1236_v28  ;;  %v1324_v28 = vpack.c.bf16 %v582_v22, %v578_v21  ;;  %v1280_v21 = vpack.c.bf16 %v620_v19, %v616_v18  ;;  %v622_v22 = vld [vmem:[#allocation10 + $0x1f8] sm:$0xff] }
 0x122   :  { %v1344_v25 = vpack.c.bf16 %v622_v22, %v618_v20  ;;  %v658_v18 = vld [vmem:[#allocation10 + $0x318] sm:$0xff]  ;;  %v655_v20 = vld [vmem:[#allocation10 + $0x300] sm:$0xff] }
 0x123   :  { %v662_v19 = vld [vmem:[#allocation10 + $0x338] sm:$0xff]  ;;  %v659_v22 = vld [vmem:[#allocation10 + $0x320] sm:$0xff] }
 0x124   :  { %1239 = vmatpush1.bf16.msra.mxu0 %v1238_v33  ;;  %v586_v33 = vld [vmem:[#allocation10 + $0xd8] sm:$0xff] }
 0x125   :  { %1241 = vmatprep.subr.bf16.mxu0 %v1240_v34  ;;  %v590_v34 = vld [vmem:[#allocation10 + $0xf8] sm:$0xff] }
 0x128   :  { %1243 = vmatpush1.bf16.msra.mxu0 %v1242_v39  ;;  %v1264_v39 = vpack.c.bf16 %v588_v32, %v584_v31  ;;  %v628_v31 = vld [vmem:[#allocation10 + $0x228] sm:$0xff]  ;;  %v626_v32 = vld [vmem:[#allocation10 + $0x218] sm:$0xff] }
 0x129   :  { %1245 = vmatprep.subr.bf16.mxu0 %v1244_v40  ;;  %v1328_v40 = vpack.c.bf16 %v590_v34, %v586_v33  ;;  %v1284_v33 = vpack.c.bf16 %v628_v31, %v624_v30  ;;  %v630_v34 = vld [vmem:[#allocation10 + $0x238] sm:$0xff] }
 0x12a   :  { %v1348_v37 = vpack.c.bf16 %v630_v34, %v626_v32  ;;  %v670_v31 = vld [vmem:[#allocation10 + $0x378] sm:$0xff]  ;;  %v663_v32 = vld [vmem:[#allocation10 + $0x340] sm:$0xff] }
 0x12c   :  { %1247 = vmatpush1.bf16.msra.mxu0 %v1246_v43  ;;  %v592_v43 = vld [vmem:[#allocation10 + $0x108] sm:$0xff] }
 0x12d   :  { %1249 = vmatprep.subr.bf16.mxu0 %v1248_v51  ;;  %v1268_v49 = vpack.c.bf16 %v596_v44, %v592_v43  ;;  %v591_v51 = vld [vmem:[#allocation10 + $0x100] sm:$0xff]  ;;  %v636_v43 = vld [vmem:[#allocation10 + $0x268] sm:$0xff]  ;;  %v634_v44 = vld [vmem:[#allocation10 + $0x258] sm:$0xff] }
 0x12e   :  { %v1270_v54 = vpack.c.bf16 %v595_v52, %v591_v51  ;;  %v1288_v45 = vpack.c.bf16 %v636_v43, %v632_v42  ;;  %v633_v51 = vld [vmem:[#allocation10 + $0x250] sm:$0xff]  ;;  %v678_v42 = vld [vmem:[#allocation10 + $0x3b8] sm:$0xff] }
 0x12f   :  { %v637_v52 = vld [vmem:[#allocation10 + $0x270] sm:$0xff] }
 0x130   :  { %1251 = vmatpush1.bf16.msra.mxu0 %v1250_v55  ;;  %v597_v55 = vld [vmem:[#allocation10 + $0x130] sm:$0xff] }
 0x131   :  { %1317 = vmatprep.subr.bf16.mxu0 %v1316_v62  ;;  %v1334_v56 = vpack.c.bf16 %v597_v55, %v593_v53  ;;  %v599_v62 = vld [vmem:[#allocation10 + $0x140] sm:$0xff]  ;;  %v1354_v53 = vpack.c.bf16 %v637_v52, %v633_v51  ;;  %v644_v55 = vld [vmem:[#allocation10 + $0x2a8] sm:$0xff] }
 0x132   :  { %v1274_v1 = vpack.c.bf16 %v603_v63, %v599_v62  ;;  %v641_v63 = vld [vmem:[#allocation10 + $0x290] sm:$0xff]  ;;  %v684_v51 = vld [vmem:[#allocation10 + $0x3e8] sm:$0xff] }
 0x1c6   :  { %v1089_v7 = vpop.f32.mrb[0].mxu0 }
 0x1c7   :  { %v1090_v8 = vpop.f32.mrb[1].mxu0 }
 0x1c8   :  { %v1091_v13 = vadd.f32 %v1090_v8, %v1089_v7  ;;  %v610_v7 = vld [vmem:[#allocation10 + $0x198] sm:$0xff]  ;;  %v1276_v8 = vpack.c.bf16 %v612_v6, %v608_v5  ;;  %v1296_v5 = vpack.c.bf16 %v652_v3, %v648_v2  ;;  %v367_v2 = vld [vmem:[%s1949_s5] sm:$0xf] }
 0x1c9   :  { %v654_v6 = vld [vmem:[#allocation10 + $0x2f8] sm:$0xff] }
 0x1ca   :  { %454 = vmatmul.mubr.f32.vlgmr.msra.gmra.mrb[0].mxu1 %v1091_v13  ;;  %525 = vmatmul.mubr.f32.vlgmr.msra.gmra.mrb[2].mxu0 %v1091_v13 }
 0x1cb   :  { %1255 = vmatpush1.bf16.msra.mxu1 %v1254_v9  ;;  %1319 = vmatpush1.bf16.msra.mxu0 %v1318_v10  ;;  %v614_v9 = vld [vmem:[#allocation10 + $0x1b8] sm:$0xff]  ;;  %v607_v10 = vld [vmem:[#allocation10 + $0x180] sm:$0xff] }
 0x1cc   :  { %1257 = vmatprep.subr.bf16.mxu1 %v1256_v14  ;;  %1321 = vmatprep.subr.bf16.mxu0 %v1320_v16  ;;  %v1340_v12 = vpack.c.bf16 %v614_v9, %v610_v7  ;;  %v1278_v13 = vpack.c.bf16 %v611_v11, %v607_v10  ;;  %v609_v14 = vld [vmem:[#allocation10 + $0x190] sm:$0xff]  ;;  %v647_v7 = vld [vmem:[#allocation10 + $0x2c0] sm:$0xff] }
 0x1cd   :  { %v613_v16 = vld [vmem:[#allocation10 + $0x1b0] sm:$0xff] }
 0x1ce   :  { %v1342_v17 = vpack.c.bf16 %v613_v16, %v609_v14  ;;  %v649_v11 = vld [vmem:[#allocation10 + $0x2d0] sm:$0xff]  ;;  %v656_v14 = vld [vmem:[#allocation10 + $0x308] sm:$0xff] }
 0x1cf   :  { %1259 = vmatpush1.bf16.msra.mxu1 %v1258_v23  ;;  %1323 = vmatpush1.bf16.msra.mxu0 %v1322_v24  ;;  %v615_v23 = vld [vmem:[#allocation10 + $0x1c0] sm:$0xff]  ;;  %v660_v16 = vld [vmem:[#allocation10 + $0x328] sm:$0xff] }
 0x1d0   :  { %1261 = vmatprep.subr.bf16.mxu1 %v1260_v27  ;;  %1325 = vmatprep.subr.bf16.mxu0 %v1324_v28  ;;  %v619_v24 = vld [vmem:[#allocation10 + $0x1e0] sm:$0xff]  ;;  %v617_v27 = vld [vmem:[#allocation10 + $0x1d0] sm:$0xff] }
 0x1d1   :  { %v1282_v26 = vpack.c.bf16 %v619_v24, %v615_v23  ;;  %v621_v28 = vld [vmem:[#allocation10 + $0x1f0] sm:$0xff] }
 0x1d2   :  { %v1346_v29 = vpack.c.bf16 %v621_v28, %v617_v27  ;;  %v657_v23 = vld [vmem:[#allocation10 + $0x310] sm:$0xff]  ;;  %v664_v27 = vld [vmem:[#allocation10 + $0x348] sm:$0xff] }
 0x1d3   :  { %1263 = vmatpush1.bf16.msra.mxu1 %v1262_v35  ;;  %1327 = vmatpush1.bf16.msra.mxu0 %v1326_v36  ;;  %v623_v35 = vld [vmem:[#allocation10 + $0x200] sm:$0xff]  ;;  %v661_v24 = vld [vmem:[#allocation10 + $0x330] sm:$0xff]  ;;  %v668_v28 = vld [vmem:[#allocation10 + $0x368] sm:$0xff] }
 0x1d4   :  { %1265 = vmatprep.subr.bf16.mxu1 %v1264_v39  ;;  %1329 = vmatprep.subr.bf16.mxu0 %v1328_v40  ;;  %v627_v36 = vld [vmem:[#allocation10 + $0x220] sm:$0xff]  ;;  %v625_v39 = vld [vmem:[#allocation10 + $0x210] sm:$0xff]  ;;  %v1304_v30 = vpack.c.bf16 %v668_v28, %v664_v27 }
 0x1d5   :  { %v1286_v38 = vpack.c.bf16 %v627_v36, %v623_v35  ;;  %v629_v40 = vld [vmem:[#allocation10 + $0x230] sm:$0xff] }
 0x1d6   :  { %v1350_v41 = vpack.c.bf16 %v629_v40, %v625_v39  ;;  %v665_v36 = vld [vmem:[#allocation10 + $0x350] sm:$0xff]  ;;  %v676_v40 = vld [vmem:[#allocation10 + $0x3a8] sm:$0xff] }
 0x1d7   :  { %1267 = vmatpush1.bf16.msra.mxu1 %v1266_v47  ;;  %1331 = vmatpush1.bf16.msra.mxu0 %v1330_v48  ;;  %v631_v47 = vld [vmem:[#allocation10 + $0x240] sm:$0xff]  ;;  %v238_v27 = vld [vmem:[#allocation5] sm:$0xff] }
 0x1d8   :  { %1269 = vmatprep.subr.bf16.mxu1 %v1268_v49  ;;  %1333 = vmatprep.subr.bf16.mxu0 %v1332_v50  ;;  %v635_v48 = vld [vmem:[#allocation10 + $0x260] sm:$0xff]  ;;  %v1352_v49 = vpack.c.bf16 %v638_v46, %v634_v44 }
 0x1d9   :  { %v1290_v50 = vpack.c.bf16 %v635_v48, %v631_v47  ;;  %v675_v46 = vld [vmem:[#allocation10 + $0x3a0] sm:$0xff]  ;;  %v673_v47 = vld [vmem:[#allocation10 + $0x390] sm:$0xff] }
 0x1db   :  { %1271 = vmatpush1.bf16.msra.mxu1 %v1270_v54  ;;  %1335 = vmatpush1.bf16.msra.mxu0 %v1334_v56  ;;  %v640_v54 = vld [vmem:[#allocation10 + $0x288] sm:$0xff]  ;;  %v642_v56 = vld [vmem:[#allocation10 + $0x298] sm:$0xff] }
 0x1dc   :  { %1273 = vmatprep.subr.bf16.mxu1 %v1272_v60  ;;  %1337 = vmatprep.subr.bf16.mxu0 %v1336_v0  ;;  %v1292_v57 = vpack.c.bf16 %v644_v55, %v640_v54  ;;  %v643_v60 = vld [vmem:[#allocation10 + $0x2a0] sm:$0xff]  ;;  %v1356_v61 = vpack.c.bf16 %v646_v58, %v642_v56  ;;  %v645_v0 = vld [vmem:[#allocation10 + $0x2b0] sm:$0xff]  ;;  %v682_v54 = vld [vmem:[#allocation10 + $0x3d8] sm:$0xff] }
 0x1dd   :  { %v1294_v62 = vpack.c.bf16 %v643_v60, %v639_v59  ;;  %v686_v55 = vld [vmem:[#allocation10 + $0x3f8] sm:$0xff]  ;;  %v679_v56 = vld [vmem:[#allocation10 + $0x3c0] sm:$0xff]  ;;  %v681_v59 = vld [vmem:[#allocation10 + $0x3d0] sm:$0xff] }
 0x1de   :  { %v683_v58 = vld [vmem:[#allocation10 + $0x3e0] sm:$0xff]  ;;  %v685_v60 = vld [vmem:[#allocation10 + $0x3f0] sm:$0xff] }
 0x1df   :  { %1275 = vmatpush1.bf16.msra.mxu1 %v1274_v1  ;;  %1339 = vmatpush1.bf16.msra.mxu0 %v1338_v4  ;;  %v1358_v1 = vpack.c.bf16 %v645_v0, %v641_v63  ;;  %v650_v4 = vld [vmem:[#allocation10 + $0x2d8] sm:$0xff]  ;;  %v1378_v63 = vpack.c.bf16 %v685_v60, %v681_v59  ;;  %v1869_v0 = vshrl.u32 %v123_v15, 7  ;;  %v889_v59 = vld [vmem:[#allocation11 + $0x70] sm:$0xff] }
 0x1e0   :  { %1277 = vmatprep.subr.bf16.mxu1 %v1276_v8  ;;  %1341 = vmatprep.subr.bf16.mxu0 %v1340_v12  ;;  %v651_v8 = vld [vmem:[#allocation10 + $0x2e0] sm:$0xff]  ;;  %v1360_v9 = vpack.c.bf16 %v654_v6, %v650_v4  ;;  %v653_v12 = vld [vmem:[#allocation10 + $0x2f0] sm:$0xff] }
 0x1e1   :  { %v1298_v10 = vpack.c.bf16 %v651_v8, %v647_v7  ;;  %v1878_v3 = vsub.s32 1, %v1869_v0  ;;  %v383_v8 = vsub.s32 3, %v1869_v0 }
 0x1e3   :  { %1279 = vmatpush1.bf16.msra.mxu1 %v1278_v13  ;;  %1343 = vmatpush1.bf16.msra.mxu0 %v1342_v17  ;;  %v1362_v13 = vpack.c.bf16 %v653_v12, %v649_v11  ;;  %v1300_v17 = vpack.c.bf16 %v660_v16, %v656_v14  ;;  %v384_v14 = vrot.slane %v367_v2, %v383_v8  ;;  %v379_v16 = vsub.s32 2, %v1869_v0 }
 0x1e4   :  { %1281 = vmatprep.subr.bf16.mxu1 %v1280_v21  ;;  %1345 = vmatprep.subr.bf16.mxu0 %v1344_v25  ;;  %v1364_v21 = vpack.c.bf16 %v662_v19, %v658_v18  ;;  %v1302_v25 = vpack.c.bf16 %v659_v22, %v655_v20 }
 0x1e5   :  { %v380_v18 = vrot.slane %v367_v2, %v379_v16 }
 0x1e7   :  { %1283 = vmatpush1.bf16.msra.mxu1 %v1282_v26  ;;  %1347 = vmatpush1.bf16.msra.mxu0 %v1346_v29  ;;  %v1366_v26 = vpack.c.bf16 %v661_v24, %v657_v23  ;;  %v666_v29 = vld [vmem:[#allocation10 + $0x358] sm:$0xff] }
 0x1e8   :  { %1285 = vmatprep.subr.bf16.mxu1 %v1284_v33  ;;  %1349 = vmatprep.subr.bf16.mxu0 %v1348_v37  ;;  %v667_v33 = vld [vmem:[#allocation10 + $0x360] sm:$0xff]  ;;  %v1368_v34 = vpack.c.bf16 %v670_v31, %v666_v29  ;;  %v669_v37 = vld [vmem:[#allocation10 + $0x370] sm:$0xff] }
 0x1e9   :  { %v1306_v35 = vpack.c.bf16 %v667_v33, %v663_v32  ;;  %v1370_v39 = vpack.c.bf16 %v669_v37, %v665_v36  ;;  %v876_v37 = vld [vmem:[#allocation11 + $0x8] sm:$0xff] }
 0x1eb   :  { %1287 = vmatpush1.bf16.msra.mxu1 %v1286_v38  ;;  %1351 = vmatpush1.bf16.msra.mxu0 %v1350_v41  ;;  %v672_v38 = vld [vmem:[#allocation10 + $0x388] sm:$0xff]  ;;  %v674_v41 = vld [vmem:[#allocation10 + $0x398] sm:$0xff] }
 0x1ec   :  { %1289 = vmatprep.subr.bf16.mxu1 %v1288_v45  ;;  %1353 = vmatprep.subr.bf16.mxu0 %v1352_v49  ;;  %v1308_v43 = vpack.c.bf16 %v676_v40, %v672_v38  ;;  %v1372_v44 = vpack.c.bf16 %v678_v42, %v674_v41  ;;  %v671_v45 = vld [vmem:[#allocation10 + $0x380] sm:$0xff]  ;;  %v677_v49 = vld [vmem:[#allocation10 + $0x3b0] sm:$0xff]  ;;  %v878_v38 = vld [vmem:[#allocation11 + $0x18] sm:$0xff] }
 0x1ed   :  { %v1310_v48 = vpack.c.bf16 %v675_v46, %v671_v45  ;;  %v1374_v52 = vpack.c.bf16 %v677_v49, %v673_v47  ;;  %v875_v40 = vld [vmem:[#allocation11] sm:$0xff]  ;;  %v877_v41 = vld [vmem:[#allocation11 + $0x10] sm:$0xff]  ;;  %v884_v49 = vld [vmem:[#allocation11 + $0x48] sm:$0xff] }
 0x1ee   :  { %v1382_v42 = vpack.c.bf16 %v877_v41, %v875_v40  ;;  %v879_v46 = vld [vmem:[#allocation11 + $0x20] sm:$0xff]  ;;  %v881_v47 = vld [vmem:[#allocation11 + $0x30] sm:$0xff] }
 0x1ef   :  { %1291 = vmatpush1.bf16.msra.mxu1 %v1290_v50  ;;  %1355 = vmatpush1.bf16.msra.mxu0 %v1354_v53  ;;  %v680_v50 = vld [vmem:[#allocation10 + $0x3c8] sm:$0xff] }
 0x1f0   :  { %1293 = vmatprep.subr.bf16.mxu1 %v1292_v57  ;;  %1357 = vmatprep.subr.bf16.mxu0 %v1356_v61  ;;  %v1312_v53 = vpack.c.bf16 %v684_v51, %v680_v50  ;;  %v1376_v57 = vpack.c.bf16 %v686_v55, %v682_v54  ;;  %v556_v61 = vld [vmem:[#allocation2 + $0x8] sm:$0xff]  ;;  %v886_v50 = vld [vmem:[#allocation11 + $0x58] sm:$0xff] }
 0x1f1   :  { %773 = vmatprep.mubr.f32.mxu1 %v556_v61  ;;  %844 = vmatprep.mubr.f32.mxu0 %v556_v61  ;;  %v1388_v51 = vpack.c.bf16 %v886_v50, %v884_v49  ;;  %v888_v55 = vld [vmem:[#allocation11 + $0x68] sm:$0xff]  ;;  %v558_v49 = vld [vmem:[#allocation5 + $0x8] sm:$0xff] }
 0x1f2   :  { %v892_v61 = vld [vmem:[#allocation11 + $0x88] sm:$0xff] }
 0x1f3   :  { %1295 = vmatpush1.bf16.msra.mxu1 %v1294_v62  ;;  %1359 = vmatpush1.bf16.msra.mxu0 %v1358_v1  ;;  %v1314_v62 = vpack.c.bf16 %v683_v58, %v679_v56  ;;  %v1872_v1 = vsub.s32 0, %v1869_v0  ;;  %v890_v56 = vld [vmem:[#allocation11 + $0x78] sm:$0xff]  ;;  %v887_v58 = vld [vmem:[#allocation11 + $0x60] sm:$0xff] }
 0x1f4   :  { %1297 = vmatprep.subr.bf16.mxu1 %v1296_v5  ;;  %1361 = vmatprep.subr.bf16.mxu0 %v1360_v9  ;;  %v376_v5 = vrot.slane %v367_v2, %v1878_v3  ;;  %v1394_v60 = vpack.c.bf16 %v889_v59, %v887_v58 }
 0x1f5   :  { %v372_v4 = vrot.slane %v367_v2, %v1872_v1  ;;  %v891_v2 = vld [vmem:[#allocation11 + $0x80] sm:$0xff] }
 0x1f7   :  { %1299 = vmatpush1.bf16.msra.mxu1 %v1298_v10  ;;  %1363 = vmatpush1.bf16.msra.mxu0 %v1362_v13 }
 0x1f8   :  { %1301 = vmatprep.subr.bf16.mxu1 %v1300_v17  ;;  %1365 = vmatprep.subr.bf16.mxu0 %v1364_v21 }
 0x1fb   :  { %1303 = vmatpush1.bf16.msra.mxu1 %v1302_v25  ;;  %1367 = vmatpush1.bf16.msra.mxu0 %v1366_v26 }
 0x1fc   :  { %1305 = vmatprep.subr.bf16.mxu1 %v1304_v30  ;;  %1369 = vmatprep.subr.bf16.mxu0 %v1368_v34 }
 0x1ff   :  { %1307 = vmatpush1.bf16.msra.mxu1 %v1306_v35  ;;  %1371 = vmatpush1.bf16.msra.mxu0 %v1370_v39  ;;  %v1380_v39 = vpack.c.bf16 %v878_v38, %v876_v37 }
 0x200   :  { %1309 = vmatprep.subr.bf16.mxu1 %v1308_v43  ;;  %1373 = vmatprep.subr.bf16.mxu0 %v1372_v44  ;;  %v880_v43 = vld [vmem:[#allocation11 + $0x28] sm:$0xff]  ;;  %v882_v44 = vld [vmem:[#allocation11 + $0x38] sm:$0xff] }
 0x201   :  { %v1384_v45 = vpack.c.bf16 %v882_v44, %v880_v43 }
 0x203   :  { %1311 = vmatpush1.bf16.msra.mxu1 %v1310_v48  ;;  %1375 = vmatpush1.bf16.msra.mxu0 %v1374_v52  ;;  %v1386_v48 = vpack.c.bf16 %v881_v47, %v879_v46  ;;  %v883_v52 = vld [vmem:[#allocation11 + $0x40] sm:$0xff] }
 0x204   :  { %1313 = vmatprep.subr.bf16.mxu1 %v1312_v53  ;;  %1377 = vmatprep.subr.bf16.mxu0 %v1376_v57  ;;  %v885_v53 = vld [vmem:[#allocation11 + $0x50] sm:$0xff]  ;;  %v1392_v57 = vpack.c.bf16 %v890_v56, %v888_v55 }
 0x205   :  { %v1390_v54 = vpack.c.bf16 %v885_v53, %v883_v52 }
 0x207   :  { %1315 = vmatpush1.bf16.msra.mxu1 %v1314_v62  ;;  %1379 = vmatpush1.bf16.msra.mxu0 %v1378_v63  ;;  %v894_v62 = vld [vmem:[#allocation11 + $0x98] sm:$0xff] }
 0x208   :  { %1381 = vmatprep.subr.bf16.mxu1 %v1380_v39  ;;  %v1396_v63 = vpack.c.bf16 %v894_v62, %v892_v61 }
 0x29d   :  { %v455_v6 = vpop.f32.mrb[0].mxu1  ;;  %v526_v7 = vpop.f32.mrb[2].mxu0 }
 0x29e   :  { %v456_v15 = vadd.f32 %v455_v6, %v372_v4  ;;  %v457_v9 = vpop.f32.mrb[1].mxu1  ;;  %v528_v10 = vpop.f32.mrb[3].mxu0  ;;  %v527_v20 = vadd.f32 %v526_v7, %v380_v18  ;;  %v893_v4 = vld [vmem:[#allocation11 + $0x90] sm:$0xff]  ;;  %v896_v6 = vld [vmem:[#allocation11 + $0xa8] sm:$0xff]  ;;  %v898_v7 = vld [vmem:[#allocation11 + $0xb8] sm:$0xff]  ;;  %v1687_v18 = vmov 0.0  }
 0x29f   :  { %v458_v11 = vadd.f32 %v457_v9, %v376_v5  ;;  %v529_v17 = vadd.f32 %v528_v10, %v384_v14  ;;  %v1398_v5 = vpack.c.bf16 %v893_v4, %v891_v2  ;;  %v895_v9 = vld [vmem:[#allocation11 + $0xa0] sm:$0xff]  ;;  %v897_v10 = vld [vmem:[#allocation11 + $0xb0] sm:$0xff] }
 0x2a0   :  { %v1051_v12 = vmul.f32 -1.442695, %v456_v15  ;;  %v1400_v15 = vpack.c.bf16 %v898_v7, %v896_v6  ;;  %v899_v14 = vld [vmem:[#allocation11 + $0xc0] sm:$0xff] }
 0x2a1   :  { %v1052_v13 = vmul.f32 -1.442695, %v458_v11  ;;  %v1053_v19 = vmul.f32 -1.442695, %v529_v17  ;;  %v900_v11 = vld [vmem:[#allocation11 + $0xc8] sm:$0xff]  ;;  %v901_v17 = vld [vmem:[#allocation11 + $0xd0] sm:$0xff] }
 0x2a2   :  { %1431 = vpow2.f32 %v1051_v12  ;;  %v1402_v12 = vpack.c.bf16 %v897_v10, %v895_v9 }
 0x2a3   :  { %1433 = vpow2.f32 %v1052_v13  ;;  %v902_v13 = vld [vmem:[#allocation11 + $0xd8] sm:$0xff] }
 0x2a4   :  { %1435 = vpow2.f32 %v1053_v19  ;;  %v1404_v19 = vpack.c.bf16 %v902_v13, %v900_v11 }
 0x2a5   :  { %1437 = vtanh.f32 %v527_v20  ;;  %v904_v20 = vld [vmem:[#allocation11 + $0xe8] sm:$0xff] }
 0x2ac   :  { %v1432_v21 = vpop.eup %1431 }
 0x2ad   :  { %v1434_v22 = vpop.eup %1433  ;;  %v534_v23 = vadd.f32 1.0, %v1432_v21  ;;  %v906_v21 = vld [vmem:[#allocation11 + $0xf8] sm:$0xff] }
 0x2ae   :  { %v540_v24 = vadd.f32 1.0, %v1434_v22  ;;  %v1436_v25 = vpop.eup %1435  ;;  %v1406_v22 = vpack.c.bf16 %v901_v17, %v899_v14 }
 0x2af   :  { %1439 = vrcp.f32 %v534_v23  ;;  %v1438_v26 = vpop.eup %1437  ;;  %v547_v31 = vadd.f32 1.0, %v1436_v25  ;;  %v1408_v23 = vpack.c.bf16 %v906_v21, %v904_v20  ;;  %v905_v25 = vld [vmem:[#allocation11 + $0xf0] sm:$0xff] }
 0x2b0   :  { %1441 = vrcp.f32 %v540_v24  ;;  %v903_v24 = vld [vmem:[#allocation11 + $0xe0] sm:$0xff] }
 0x2b1   :  { %1443 = vrcp.f32 %v547_v31 }
 0x2b9   :  { %v1440_v28 = vpop.eup %1439 }
 0x2ba   :  { %v1442_v29 = vpop.eup %1441  ;;  %v551_v30 = vmul.f32 %v1440_v28, %v1438_v26  ;;  %v1410_v26 = vpack.c.bf16 %v905_v25, %v903_v24 }
 0x2bb   :  { %v550_v32 = vmul.f32 %v1442_v29, %v238_v27  ;;  %v1444_v34 = vpop.eup %1443  ;;  %v687_v27 = vld [vmem:[%s1951_s7] sm:$0xf]  ;;  %s1688_s7 = smov [#allocation14]  }
 0x2bc   :  { %v692_v28 = vrot.slane %v687_v27, %v1872_v1  ;;  %v696_v29 = vrot.slane %v687_v27, %v1878_v3  ;;  %v704_v38 = vrot.slane %v687_v27, %v383_v8  ;;  %v700_v40 = vrot.slane %v687_v27, %v379_v16  ;;  %s1013_s13 = sshll.u32 %s1688_s7, 4  ;;  %s1014_s13 = int_to_ptr.vmem [resolvable:$true] %s1013_s13 }
 0x2bd   :  { %v552_v33 = vadd.f32 %v551_v30, %v550_v32  ;;  %s1595_s17 = scalar_lea.vmem %s1014_s13, 256  ;;  %p1600_p7 = scmp.lt.s32.totalorder %s1014_s13, %s1014_s13 }
 0x2be   :  { %p1596_p6 = scmp.ne.s32.totalorder %s1014_s13, %s1595_s17  ;;  %p1601_p8 = scmp.lt.s32.totalorder %s1595_s17, %s1595_s17 }
 0x2bf   :  { %995 = vst [vmem:[#allocation16] sm:$0xff] %v552_v33  ;;  %1445 = vtanh.f32 %v552_v33 }
 0x2c0   :  { %p1602_p9 = por %p1601_p8, %p1600_p7 }
 0x2c2   :  { %p1603_p10 = pnand %p1602_p9, %p1596_p6 }
 0x2c9   :  { %v1446_v35 = vpop.eup %1445 }
 0x2ca   :  { %v554_v36 = vmul.f32 %v1446_v35, %v1444_v34 }
 0x2cc   :  { %774 = vmatmul.mubr.f32.vlgmr.msra.gmra.mrb[2].mxu1 %v554_v36  ;;  %992 = vst [vmem:[#allocation14] sm:$0xff] %v554_v36  ;;  %845 = vmatmul.mubr.f32.vlgmr.msra.gmra.mrb[4].mxu0 %v554_v36 }
 0x2cd   :  { %1383 = vmatpush1.bf16.msra.mxu1 %v1382_v42  ;;  %983 = vmatprep.mubr.f32.mxu1 %v1687_v18 }
 0x2ce   :  { %1385 = vmatprep.subr.bf16.mxu1 %v1384_v45 }
 0x2d1   :  { %1387 = vmatpush1.bf16.msra.mxu1 %v1386_v48 }
 0x2d2   :  { %1389 = vmatprep.subr.bf16.mxu1 %v1388_v51 }
 0x2d5   :  { %1391 = vmatpush1.bf16.msra.mxu1 %v1390_v54 }
 0x2d6   :  { %1393 = vmatprep.subr.bf16.mxu1 %v1392_v57 }
 0x2d9   :  { %1395 = vmatpush1.bf16.msra.mxu1 %v1394_v60 }
 0x2da   :  { %1397 = vmatprep.subr.bf16.mxu1 %v1396_v63 }
 0x2dd   :  { %1399 = vmatpush1.bf16.msra.mxu1 %v1398_v5 }
 0x2de   :  { %1401 = vmatprep.subr.bf16.mxu1 %v1400_v15 }
 0x2e1   :  { %1403 = vmatpush1.bf16.msra.mxu1 %v1402_v12 }
 0x2e2   :  { %1405 = vmatprep.subr.bf16.mxu1 %v1404_v19 }
 0x2e5   :  { %1407 = vmatpush1.bf16.msra.mxu1 %v1406_v22 }
 0x2e6   :  { %1409 = vmatprep.subr.bf16.mxu1 %v1408_v23 }
 0x2e9   :  { %1411 = vmatpush1.bf16.msra.mxu1 %v1410_v26 }
 0x39f   :  { %v775_v30 = vpop.f32.mrb[2].mxu1  ;;  %v846_v31 = vpop.f32.mrb[4].mxu0 }
 0x3a0   :  { %v776_v32 = vadd.f32 %v775_v30, %v692_v28  ;;  %v777_v33 = vpop.f32.mrb[3].mxu1  ;;  %v848_v34 = vpop.f32.mrb[5].mxu0  ;;  %v847_v42 = vadd.f32 %v846_v31, %v700_v40 }
 0x3a1   :  { %v778_v35 = vadd.f32 %v777_v33, %v696_v29  ;;  %v849_v39 = vadd.f32 %v848_v34, %v704_v38 }
 0x3a2   :  { %v1054_v36 = vmul.f32 -1.442695, %v776_v32 }
 0x3a3   :  { %v1055_v37 = vmul.f32 -1.442695, %v778_v35  ;;  %v1056_v41 = vmul.f32 -1.442695, %v849_v39 }
 0x3a4   :  { %1447 = vpow2.f32 %v1054_v36 }
 0x3a5   :  { %1449 = vpow2.f32 %v1055_v37 }
 0x3a6   :  { %1451 = vpow2.f32 %v1056_v41 }
 0x3a7   :  { %1453 = vtanh.f32 %v847_v42 }
 0x3ae   :  { %v1448_v43 = vpop.eup %1447 }
 0x3af   :  { %v1450_v44 = vpop.eup %1449  ;;  %v854_v45 = vadd.f32 1.0, %v1448_v43 }
 0x3b0   :  { %v860_v46 = vadd.f32 1.0, %v1450_v44  ;;  %v1452_v47 = vpop.eup %1451 }
 0x3b1   :  { %1455 = vrcp.f32 %v854_v45  ;;  %v1454_v48 = vpop.eup %1453  ;;  %v867_v52 = vadd.f32 1.0, %v1452_v47 }
 0x3b2   :  { %1457 = vrcp.f32 %v860_v46 }
 0x3b3   :  { %1459 = vrcp.f32 %v867_v52 }
 0x3bb   :  { %v1456_v8 = vpop.eup %1455 }
 0x3bc   :  { %v1458_v50 = vpop.eup %1457  ;;  %v871_v51 = vmul.f32 %v1456_v8, %v1454_v48 }
 0x3bd   :  { %v870_v53 = vmul.f32 %v1458_v50, %v558_v49  ;;  %v1460_v16 = vpop.eup %1459 }
 0x3bf   :  { %v872_v0 = vadd.f32 %v871_v51, %v870_v53 }
 0x3c1   :  { %997 = vst [vmem:[#allocation16 + $0x8] sm:$0xff] %v872_v0  ;;  %1461 = vtanh.f32 %v872_v0 }
 0x3cb   :  { %v1462_v54 = vpop.eup %1461 }
 0x3cc   :  { %v874_v55 = vmul.f32 %v1462_v54, %v1460_v16 }
 0x3ce   :  { %984 = vmatmul.mubr.f32.vlgmr.msra.gmra.mrb[4].mxu1 %v874_v55  ;;  %994 = vst [vmem:[#allocation14 + $0x8] sm:$0xff] %v874_v55 }
 0x3cf   :  { %1606 = shalt.err (!%p1603_p10)
}
 0x3d0   :  { %s1607_s18 = scalar_lea.hbm %s1955_s11, 256 }
 0x3d1   :  { %p1608_p11 = scmp.ne.s32.totalorder %s1955_s11, %s1607_s18  ;;  %p1611_p12 = scmp.lt.u32.totalorder %s1607_s18, %s1955_s11 }
 0x3d3   :  { %p1613_p13 = pnand %p1611_p12, %p1608_p11 }
 0x3d5   :  { %1616 = shalt.err (!%p1613_p13)
}
 0x3d6   :  { %1019 = dma.vmem_to_hbm [thread:$0]  %s1014_s13, 256, %s1955_s11, [#allocation15], %s1675_s15, %s1675_s15, %s1676_s16  }
 0x3d7   :  { %s1689_s27 = smov [#allocation16]  }
 0x3d8   :  { %s1025_s24 = sshll.u32 %s1689_s27, 4  ;;  %s1026_s24 = int_to_ptr.vmem [resolvable:$true] %s1025_s24 }
 0x3d9   :  { %s1617_s28 = scalar_lea.vmem %s1026_s24, 256  ;;  %p1622_p1 = scmp.lt.s32.totalorder %s1026_s24, %s1026_s24 }
 0x3da   :  { %p1618_p0 = scmp.ne.s32.totalorder %s1026_s24, %s1617_s28  ;;  %p1623_p2 = scmp.lt.s32.totalorder %s1617_s28, %s1617_s28 }
 0x3dc   :  { %p1624_p3 = por %p1623_p2, %p1622_p1 }
 0x3de   :  { %p1625_p4 = pnand %p1624_p3, %p1618_p0 }
 0x3e0   :  { %1628 = shalt.err (!%p1625_p4)
}
 0x3e1   :  { %s1629_s22 = scalar_lea.hbm %s1956_s12, 256 }
 0x3e2   :  { %p1630_p5 = scmp.ne.s32.totalorder %s1956_s12, %s1629_s22  ;;  %p1633_p6 = scmp.lt.u32.totalorder %s1629_s22, %s1956_s12 }
 0x3e4   :  { %p1635_p7 = pnand %p1633_p6, %p1630_p5 }
 0x3e6   :  { %1638 = shalt.err (!%p1635_p7)
}
 0x3e7   :  { %1031 = dma.vmem_to_hbm [thread:$0]  %s1026_s24, 256, %s1956_s12, [#allocation15], %s1675_s15, %s1675_s15, %s1676_s16  }
 0x3e8   :  { %v907_v56 = vld [vmem:[%s1953_s9] sm:$0x3]  ;;  %s1690_s7 = smov [#allocation13]  }
 0x3e9   :  { %v912_v57 = vrot.slane %v907_v56, %v1872_v1  ;;  %v916_v58 = vrot.slane %v907_v56, %v1878_v3  ;;  %s1004_s13 = sshll.u32 %s1690_s7, 4  ;;  %s1005_s13 = int_to_ptr.vmem [resolvable:$true] %s1004_s13 }
 0x3ea   :  { %s1639_s17 = scalar_lea.vmem %s1005_s13, 256  ;;  %p1644_p9 = scmp.lt.s32.totalorder %s1005_s13, %s1005_s13 }
 0x3eb   :  { %p1640_p8 = scmp.ne.s32.totalorder %s1005_s13, %s1639_s17  ;;  %p1645_p10 = scmp.lt.s32.totalorder %s1639_s17, %s1639_s17 }
 0x3ed   :  { %p1646_p11 = por %p1645_p10, %p1644_p9 }
 0x3ef   :  { %p1647_p12 = pnand %p1646_p11, %p1640_p8 }
 0x4a1   :  { %v985_v59 = vpop.f32.mrb[4].mxu1 }
 0x4a2   :  { %v986_v60 = vadd.f32 %v985_v59, %v912_v57  ;;  %v987_v61 = vpop.f32.mrb[5].mxu1 }
 0x4a3   :  { %v988_v62 = vadd.f32 %v987_v61, %v916_v58 }
 0x4a4   :  { %990 = vst [vmem:[#allocation13] sm:$0xff] %v986_v60 }
 0x4a5   :  { %991 = vst [vmem:[#allocation13 + $0x8] sm:$0xff] %v988_v62 }
 0x4a6   :  { %1650 = shalt.err (!%p1647_p12)
}
 0x4a7   :  { %s1651_s15 = scalar_lea.hbm %s1954_s10, 256 }
 0x4a8   :  { %p1652_p13 = scmp.ne.s32.totalorder %s1954_s10, %s1651_s15  ;;  %p1655_p0 = scmp.lt.u32.totalorder %s1651_s15, %s1954_s10 }
 0x4aa   :  { %p1657_p1 = pnand %p1655_p0, %p1652_p13 }
 0x4ac   :  { %1660 = shalt.err (!%p1657_p1)
}
 0x4ad   :  { %1007 = dma.vmem_to_hbm [thread:$0]  %s1005_s13, 256, %s1954_s10, [#allocation4]  }
 0x4ae   :  { %1669 = dma.done.wait [#allocation4], 256  }
 0x4af   :  { %1670 = vsyncadd [#allocation4], 4294967040 }
 0x4b0   :  { %1671 = dma.done.wait [#allocation15], 512  }
 0x4b1   :  { %1672 = vsyncadd [#allocation15], 4294966784 }
 0x4b2   :  { %1041 = vsyncpa [#allocation3], 1 }
 0x4b3   :  { %1042 = vsyncpa [#allocation6], 1 }
 0x4b4   :  { %1043 = vsyncpa [#allocation9], 1 }
 0x4b5   :  { %1044 = vsyncpa [#allocation12], 1 }
 0x4b6   :  { %1045 = vsyncpa [#allocation4], 1 }
 0x4b7   :  { %1046 = vsyncpa [#allocation15], 1 }

</bundles_post_ra>
